<compile_context>
chip_gen: v5e
topology: v5e:2x2
jax: 0.10.0
libtpu: 0.0.40
codegen_flags: <defaults>
</compile_context>

<pallas_src>
import jax
import jax.numpy as jnp
from jax.experimental import pallas as pl
from jax.experimental.pallas import tpu as pltpu


def basic_block_kernel(x_ref, w1_ref, b1_ref, w2_ref, b2_ref, out_ref):
    """conv3x3 -> bias -> ReLU -> conv3x3 -> bias -> +identity -> ReLU.

    Eval-mode BN is pre-folded: per-output-channel scale lives in the weights,
    the bias is passed separately in f32.

    x_ref  : (B, H, W, Cin)     input block, compute dtype (bf16 or f32)
    w1_ref : (3, 3*Cin,  Cout)  conv1 weights, kx folded into K (HWIO order)
    b1_ref : (1, Cout)          folded BN1 bias (f32)
    w2_ref : (3, 3*Cout, Cout)  conv2 weights, kx folded into K
    b2_ref : (1, Cout)          folded BN2 bias (f32)
    out_ref: (B, H, W, Cout)    output block, compute dtype
    """
    B, H, W, _ = x_ref.shape
    mm_dtype = x_ref.dtype

    def conv3x3(x, w_ref):
        # x: (B, H, W, C) value (mm_dtype); w_ref: (3, 3*C, Cout).
        # The 3 kx taps are concatenated on the channel axis (K = 3*C), so the
        # conv is 3 MXU matmuls with internal accumulation.
        C = x.shape[-1]
        K = 3 * C
        Cout = w_ref.shape[-1]
        M = B * H * W

        # Width halo (kx taps) at the value level, in compute dtype.
        zcol = jnp.zeros((B, H, 1, C), x.dtype)
        left = jnp.concatenate([zcol, x[:, :, :W - 1, :]], axis=2)   # X[., x-1]
        right = jnp.concatenate([x[:, :, 1:, :], zcol], axis=2)      # X[., x+1]
        xcat = jnp.concatenate([left, x, right], axis=-1)            # (B,H,W,3C)

        # Height halo (ky taps): one zero row above/below, then aligned row
        # slices -- no padded VMEM scratch, no offset interior stores.
        zrow = jnp.zeros((B, 1, W, K), x.dtype)
        xcat_p = jnp.concatenate([zrow, xcat, zrow], axis=1)         # (B,H+2,W,3C)

        # TODO(synk): optional full im2col (K = 9*C) for v6e/v7x's 256-wide MXU
        # when C is large enough to justify the extra operand materialization.
        acc = jnp.dot(xcat_p[:, 0:H].reshape(M, K), w_ref[0],
                      preferred_element_type=jnp.float32)
        acc = acc + jnp.dot(xcat_p[:, 1:H + 1].reshape(M, K), w_ref[1],
                            preferred_element_type=jnp.float32)
        acc = acc + jnp.dot(xcat_p[:, 2:H + 2].reshape(M, K), w_ref[2],
                            preferred_element_type=jnp.float32)
        return acc.reshape(B, H, W, Cout)                            # f32

    # ---- conv1 (BN1 scale folded into w1) -> bias -> ReLU ----
    h = jnp.maximum(conv3x3(x_ref[...], w1_ref) + b1_ref[...], 0.0)

    # ---- conv2 (BN2 scale folded into w2) -> bias -> +identity -> ReLU ----
    y = conv3x3(h.astype(mm_dtype), w2_ref) + b2_ref[...]
    # Residual re-read from the (VMEM-resident) input block right before use,
    # so no full-tile f32 copy is kept live across both convs.
    y = y + x_ref[...].astype(jnp.float32)
    out_ref[...] = jnp.maximum(y, 0.0).astype(out_ref.dtype)
    # TODO(synk): lane-dense (H, W*C) output layout for C < 128 to avoid
    # masked vst on the writeback path.


def basic_block_forward(x_nchw, w1_oihw, bn1, w2_oihw, bn2, eps=1e-5,
                        compute_dtype=jnp.bfloat16, batch_tile=1):
    """NCHW in / NCHW out.  Eval-mode BN folded; stride=1 identity block."""
    N, Cin, H, W = x_nchw.shape
    Cout = w1_oihw.shape[0]
    assert Cin == Cout, "identity residual requires inplanes == planes"
    assert N % batch_tile == 0
    # TODO(synk): stride>1 / downsample-projection BasicBlocks and
    # training-mode (batch-statistics) BN are not implemented here.

    def fold(w_oihw, bn):
        gamma, beta, mean, var = bn
        scale = (gamma / jnp.sqrt(var + eps)).astype(jnp.float32)
        bias = (beta - mean * scale).astype(jnp.float32).reshape(1, -1)
        # OIHW -> HWIO with BN scale folded into output channels, then fold
        # the kx taps into the contraction dim: (3, 3, C, Cout) -> (3, 3C, Cout).
        w = jnp.transpose(w_oihw, (2, 3, 1, 0)) * scale[None, None, None, :]
        c_in = w.shape[2]
        return w.reshape(3, 3 * c_in, Cout).astype(compute_dtype), bias

    w1, b1 = fold(w1_oihw, bn1)
    w2, b2 = fold(w2_oihw, bn2)

    # NCHW -> NHWC (channels-last = lane dim).
    # TODO(synk): keep activations NHWC end-to-end in a real network; these
    # transposes exist only to match the PyTorch NCHW interface.
    x_nhwc = jnp.transpose(x_nchw, (0, 2, 3, 1)).astype(compute_dtype)

    itemsize = jnp.dtype(compute_dtype).itemsize
    flops = int(2 * 2 * 9 * H * W * Cin * Cout * N)            # 2 convs, MAC=2
    bytes_accessed = int(N * H * W * (Cin + Cout) * itemsize
                         + (w1.size + w2.size) * itemsize
                         + (b1.size + b2.size) * 4)

    out_nhwc = pl.pallas_call(
        basic_block_kernel,
        out_shape=jax.ShapeDtypeStruct((N, H, W, Cout), compute_dtype),
        grid=(N // batch_tile,),
        in_specs=[
            pl.BlockSpec((batch_tile, H, W, Cin), lambda n: (n, 0, 0, 0)),
            pl.BlockSpec((3, 3 * Cin, Cout), lambda n: (0, 0, 0)),
            pl.BlockSpec((1, Cout), lambda n: (0, 0)),
            pl.BlockSpec((3, 3 * Cout, Cout), lambda n: (0, 0, 0)),
            pl.BlockSpec((1, Cout), lambda n: (0, 0)),
        ],
        out_specs=pl.BlockSpec((batch_tile, H, W, Cout), lambda n: (n, 0, 0, 0)),
        compiler_params=pltpu.CompilerParams(
            dimension_semantics=("parallel",)),
        # TODO(synk): for large batch_tile / H tiles raise vmem_limit_bytes
        # (v5e scoped default is 16 MiB; v7x physical VMEM is 64 MiB).
        cost_estimate=pl.CostEstimate(flops=flops, transcendentals=0,
                                      bytes_accessed=bytes_accessed),
    )(x_nhwc, w1, b1, w2, b2)

    # NHWC -> NCHW.
    return jnp.transpose(out_nhwc, (0, 3, 1, 2))


def basic_block_reference(x_nchw, w1_oihw, bn1, w2_oihw, bn2, eps=1e-5):
    """Pure-JAX reference mirroring the PyTorch BasicBlock (eval mode)."""
    def bn_apply(y, bn):
        gamma, beta, mean, var = bn
        scale = (gamma / jnp.sqrt(var + eps)).reshape(1, -1, 1, 1)
        bias = (beta - mean * gamma / jnp.sqrt(var + eps)).reshape(1, -1, 1, 1)
        return y * scale + bias

    dn = ('NCHW', 'OIHW', 'NCHW')
    out = jax.lax.conv_general_dilated(x_nchw, w1_oihw, (1, 1),
                                       ((1, 1), (1, 1)), dimension_numbers=dn)
    out = jax.nn.relu(bn_apply(out, bn1))
    out = jax.lax.conv_general_dilated(out, w2_oihw, (1, 1),
                                       ((1, 1), (1, 1)), dimension_numbers=dn)
    out = bn_apply(out, bn2)
    return jax.nn.relu(out + x_nchw)


if __name__ == "__main__":
    # Small deterministic config: inplanes = planes = 8, stride = 1.
    N, C, H, W = 2, 8, 16, 16
    key = jax.random.PRNGKey(0)
    k = jax.random.split(key, 9)

    x = jax.random.normal(k[0], (N, C, H, W), jnp.float32)

    # conv weights (PyTorch layout OIHW, bias=False)
    w1 = jax.random.normal(k[1], (C, C, 3, 3), jnp.float32) * 0.1
    w2 = jax.random.normal(k[2], (C, C, 3, 3), jnp.float32) * 0.1

    # BatchNorm params: (gamma, beta, running_mean, running_var)
    bn1 = (1.0 + 0.1 * jax.random.normal(k[3], (C,), jnp.float32),
           0.1 * jax.random.normal(k[4], (C,), jnp.float32),
           0.1 * jax.random.normal(k[5], (C,), jnp.float32),
           1.0 + 0.1 * jax.random.uniform(k[6], (C,), jnp.float32))
    bn2 = (1.0 + 0.1 * jax.random.normal(k[7], (C,), jnp.float32),
           0.1 * jax.random.normal(k[8], (C,), jnp.float32),
           jnp.zeros((C,), jnp.float32),
           jnp.ones((C,), jnp.float32))

    ref = jax.block_until_ready(basic_block_reference(x, w1, bn1, w2, bn2))

    # f32 path: tight-ish numerical check against the reference.
    out_f32 = jax.block_until_ready(
        basic_block_forward(x, w1, bn1, w2, bn2, compute_dtype=jnp.float32))
    assert out_f32.shape == (N, C, H, W), out_f32.shape
    assert jnp.allclose(out_f32, ref, atol=1e-3, rtol=1e-3), \
        float(jnp.max(jnp.abs(out_f32 - ref)))

    # bf16 path (default): halved HBM traffic, f32 accumulation; loose check.
    # Note: the skip connection uses the bf16-cast input, so the residual is
    # bf16-rounded relative to the f32 PyTorch reference.
    out_bf16 = jax.block_until_ready(basic_block_forward(x, w1, bn1, w2, bn2))
    assert out_bf16.shape == (N, C, H, W), out_bf16.shape
    assert jnp.allclose(out_bf16.astype(jnp.float32), ref,
                        atol=1e-1, rtol=1e-1), \
        float(jnp.max(jnp.abs(out_bf16.astype(jnp.float32) - ref)))

    # Batched grid step (batch_tile=2): exercises the multi-image path.
    out_bt2 = jax.block_until_ready(
        basic_block_forward(x, w1, bn1, w2, bn2, batch_tile=2))
    assert out_bt2.shape == (N, C, H, W), out_bt2.shape
    assert jnp.allclose(out_bt2.astype(jnp.float32), ref,
                        atol=1e-1, rtol=1e-1), \
        float(jnp.max(jnp.abs(out_bt2.astype(jnp.float32) - ref)))

    print("KERNEL_OK")
</pallas_src>

<mosaic_0001>
module attributes {stable_mosaic.version = 11 : i64} {
  func.func @basic_block_kernel(%arg0: i32, %arg1: memref<1x16x16x8xf32, #tpu.memory_space<vmem>>, %arg2: memref<3x24x8xf32, #tpu.memory_space<vmem>>, %arg3: memref<1x8xf32, #tpu.memory_space<vmem>>, %arg4: memref<3x24x8xf32, #tpu.memory_space<vmem>>, %arg5: memref<1x8xf32, #tpu.memory_space<vmem>>, %arg6: memref<1x16x16x8xf32, #tpu.memory_space<vmem>>) attributes {dimension_semantics = [#tpu.dimension_semantics<parallel>], iteration_bounds = array<i64: 2>, scalar_prefetch = 0 : i64, scratch_operands = 0 : i64, tpu.core_type = #tpu.core_type<tc>, window_params = [{transform_indices = @transform_0, window_bounds = array<i64: 1, 16, 16, 8>}, {pipeline_mode = #tpu.pipeline_mode<synchronous>, transform_indices = @transform_1, window_bounds = array<i64: 3, 24, 8>}, {pipeline_mode = #tpu.pipeline_mode<synchronous>, transform_indices = @transform_2, window_bounds = array<i64: 1, 8>}, {pipeline_mode = #tpu.pipeline_mode<synchronous>, transform_indices = @transform_3, window_bounds = array<i64: 3, 24, 8>}, {pipeline_mode = #tpu.pipeline_mode<synchronous>, transform_indices = @transform_4, window_bounds = array<i64: 1, 8>}, {transform_indices = @transform_5, window_bounds = array<i64: 1, 16, 16, 8>}]} {
    %c0 = arith.constant 0 : index
    %c0_0 = arith.constant 0 : index
    %c0_1 = arith.constant 0 : index
    %c0_2 = arith.constant 0 : index
    %0 = vector.load %arg1[%c0, %c0_0, %c0_1, %c0_2] : memref<1x16x16x8xf32, #tpu.memory_space<vmem>>, vector<1x16x16x8xf32>
    %cst = arith.constant 0.000000e+00 : f32
    %1 = vector.broadcast %cst : f32 to vector<1x16x1x8xf32>
    %2 = vector.extract_strided_slice %0 {offsets = [0, 0, 0, 0], sizes = [1, 16, 15, 8], strides = [1, 1, 1, 1]} : vector<1x16x16x8xf32> to vector<1x16x15x8xf32>
    %3 = tpu.concatenate %1, %2 in 2 : vector<1x16x1x8xf32>, vector<1x16x15x8xf32> -> vector<1x16x16x8xf32>
    %4 = vector.extract_strided_slice %0 {offsets = [0, 0, 1, 0], sizes = [1, 16, 15, 8], strides = [1, 1, 1, 1]} : vector<1x16x16x8xf32> to vector<1x16x15x8xf32>
    %5 = tpu.concatenate %4, %1 in 2 : vector<1x16x15x8xf32>, vector<1x16x1x8xf32> -> vector<1x16x16x8xf32>
    %6 = tpu.concatenate %3, %0, %5 in 3 : vector<1x16x16x8xf32>, vector<1x16x16x8xf32>, vector<1x16x16x8xf32> -> vector<1x16x16x24xf32>
    %cst_3 = arith.constant 0.000000e+00 : f32
    %7 = vector.broadcast %cst_3 : f32 to vector<1x1x16x24xf32>
    %8 = tpu.concatenate %7, %6, %7 in 1 : vector<1x1x16x24xf32>, vector<1x16x16x24xf32>, vector<1x1x16x24xf32> -> vector<1x18x16x24xf32>
    %9 = vector.extract_strided_slice %8 {offsets = [0, 0, 0, 0], sizes = [1, 16, 16, 24], strides = [1, 1, 1, 1]} : vector<1x18x16x24xf32> to vector<1x16x16x24xf32>
    %10 = vector.shape_cast %9 : vector<1x16x16x24xf32> to vector<256x24xf32>
    %c0_4 = arith.constant 0 : index
    %c0_5 = arith.constant 0 : index
    %c0_6 = arith.constant 0 : index
    %11 = vector.load %arg2[%c0_4, %c0_5, %c0_6] : memref<3x24x8xf32, #tpu.memory_space<vmem>>, vector<1x24x8xf32>
    %12 = vector.shape_cast %11 : vector<1x24x8xf32> to vector<24x8xf32>
    %cst_7 = arith.constant dense<0.000000e+00> : vector<256x8xf32>
    %13 = tpu.matmul %10, %12, %cst_7 {dimension_numbers = #tpu.dot_dimension_numbers<[1], [0], [0], [1], [0, 0, 1, 1], [], []>} : vector<256x24xf32>, vector<24x8xf32>, vector<256x8xf32> -> vector<256x8xf32>
    %14 = vector.extract_strided_slice %8 {offsets = [0, 1, 0, 0], sizes = [1, 16, 16, 24], strides = [1, 1, 1, 1]} : vector<1x18x16x24xf32> to vector<1x16x16x24xf32>
    %15 = vector.shape_cast %14 : vector<1x16x16x24xf32> to vector<256x24xf32>
    %c1 = arith.constant 1 : index
    %c0_8 = arith.constant 0 : index
    %c0_9 = arith.constant 0 : index
    %16 = vector.load %arg2[%c1, %c0_8, %c0_9] : memref<3x24x8xf32, #tpu.memory_space<vmem>>, vector<1x24x8xf32>
    %17 = vector.shape_cast %16 : vector<1x24x8xf32> to vector<24x8xf32>
    %cst_10 = arith.constant dense<0.000000e+00> : vector<256x8xf32>
    %18 = tpu.matmul %15, %17, %cst_10 {dimension_numbers = #tpu.dot_dimension_numbers<[1], [0], [0], [1], [0, 0, 1, 1], [], []>} : vector<256x24xf32>, vector<24x8xf32>, vector<256x8xf32> -> vector<256x8xf32>
    %19 = arith.addf %13, %18 : vector<256x8xf32>
    %20 = vector.extract_strided_slice %8 {offsets = [0, 2, 0, 0], sizes = [1, 16, 16, 24], strides = [1, 1, 1, 1]} : vector<1x18x16x24xf32> to vector<1x16x16x24xf32>
    %21 = vector.shape_cast %20 : vector<1x16x16x24xf32> to vector<256x24xf32>
    %c2 = arith.constant 2 : index
    %c0_11 = arith.constant 0 : index
    %c0_12 = arith.constant 0 : index
    %22 = vector.load %arg2[%c2, %c0_11, %c0_12] : memref<3x24x8xf32, #tpu.memory_space<vmem>>, vector<1x24x8xf32>
    %23 = vector.shape_cast %22 : vector<1x24x8xf32> to vector<24x8xf32>
    %cst_13 = arith.constant dense<0.000000e+00> : vector<256x8xf32>
    %24 = tpu.matmul %21, %23, %cst_13 {dimension_numbers = #tpu.dot_dimension_numbers<[1], [0], [0], [1], [0, 0, 1, 1], [], []>} : vector<256x24xf32>, vector<24x8xf32>, vector<256x8xf32> -> vector<256x8xf32>
    %25 = arith.addf %19, %24 : vector<256x8xf32>
    %26 = vector.shape_cast %25 : vector<256x8xf32> to vector<1x16x16x8xf32>
    %c0_14 = arith.constant 0 : index
    %c0_15 = arith.constant 0 : index
    %27 = vector.load %arg3[%c0_14, %c0_15] : memref<1x8xf32, #tpu.memory_space<vmem>>, vector<1x8xf32>
    %28 = vector.shape_cast %27 : vector<1x8xf32> to vector<1x1x1x8xf32>
    %29 = vector.broadcast %28 : vector<1x1x1x8xf32> to vector<1x16x16x8xf32>
    %30 = arith.addf %26, %29 : vector<1x16x16x8xf32>
    %cst_16 = arith.constant 0.000000e+00 : f32
    %31 = vector.broadcast %cst_16 : f32 to vector<1x16x16x8xf32>
    %32 = arith.maximumf %30, %31 : vector<1x16x16x8xf32>
    %cst_17 = arith.constant 0.000000e+00 : f32
    %33 = vector.broadcast %cst_17 : f32 to vector<1x16x1x8xf32>
    %34 = vector.extract_strided_slice %32 {offsets = [0, 0, 0, 0], sizes = [1, 16, 15, 8], strides = [1, 1, 1, 1]} : vector<1x16x16x8xf32> to vector<1x16x15x8xf32>
    %35 = tpu.concatenate %33, %34 in 2 : vector<1x16x1x8xf32>, vector<1x16x15x8xf32> -> vector<1x16x16x8xf32>
    %36 = vector.extract_strided_slice %32 {offsets = [0, 0, 1, 0], sizes = [1, 16, 15, 8], strides = [1, 1, 1, 1]} : vector<1x16x16x8xf32> to vector<1x16x15x8xf32>
    %37 = tpu.concatenate %36, %33 in 2 : vector<1x16x15x8xf32>, vector<1x16x1x8xf32> -> vector<1x16x16x8xf32>
    %38 = tpu.concatenate %35, %32, %37 in 3 : vector<1x16x16x8xf32>, vector<1x16x16x8xf32>, vector<1x16x16x8xf32> -> vector<1x16x16x24xf32>
    %cst_18 = arith.constant 0.000000e+00 : f32
    %39 = vector.broadcast %cst_18 : f32 to vector<1x1x16x24xf32>
    %40 = tpu.concatenate %39, %38, %39 in 1 : vector<1x1x16x24xf32>, vector<1x16x16x24xf32>, vector<1x1x16x24xf32> -> vector<1x18x16x24xf32>
    %41 = vector.extract_strided_slice %40 {offsets = [0, 0, 0, 0], sizes = [1, 16, 16, 24], strides = [1, 1, 1, 1]} : vector<1x18x16x24xf32> to vector<1x16x16x24xf32>
    %42 = vector.shape_cast %41 : vector<1x16x16x24xf32> to vector<256x24xf32>
    %c0_19 = arith.constant 0 : index
    %c0_20 = arith.constant 0 : index
    %c0_21 = arith.constant 0 : index
    %43 = vector.load %arg4[%c0_19, %c0_20, %c0_21] : memref<3x24x8xf32, #tpu.memory_space<vmem>>, vector<1x24x8xf32>
    %44 = vector.shape_cast %43 : vector<1x24x8xf32> to vector<24x8xf32>
    %cst_22 = arith.constant dense<0.000000e+00> : vector<256x8xf32>
    %45 = tpu.matmul %42, %44, %cst_22 {dimension_numbers = #tpu.dot_dimension_numbers<[1], [0], [0], [1], [0, 0, 1, 1], [], []>} : vector<256x24xf32>, vector<24x8xf32>, vector<256x8xf32> -> vector<256x8xf32>
    %46 = vector.extract_strided_slice %40 {offsets = [0, 1, 0, 0], sizes = [1, 16, 16, 24], strides = [1, 1, 1, 1]} : vector<1x18x16x24xf32> to vector<1x16x16x24xf32>
    %47 = vector.shape_cast %46 : vector<1x16x16x24xf32> to vector<256x24xf32>
    %c1_23 = arith.constant 1 : index
    %c0_24 = arith.constant 0 : index
    %c0_25 = arith.constant 0 : index
    %48 = vector.load %arg4[%c1_23, %c0_24, %c0_25] : memref<3x24x8xf32, #tpu.memory_space<vmem>>, vector<1x24x8xf32>
    %49 = vector.shape_cast %48 : vector<1x24x8xf32> to vector<24x8xf32>
    %cst_26 = arith.constant dense<0.000000e+00> : vector<256x8xf32>
    %50 = tpu.matmul %47, %49, %cst_26 {dimension_numbers = #tpu.dot_dimension_numbers<[1], [0], [0], [1], [0, 0, 1, 1], [], []>} : vector<256x24xf32>, vector<24x8xf32>, vector<256x8xf32> -> vector<256x8xf32>
    %51 = arith.addf %45, %50 : vector<256x8xf32>
    %52 = vector.extract_strided_slice %40 {offsets = [0, 2, 0, 0], sizes = [1, 16, 16, 24], strides = [1, 1, 1, 1]} : vector<1x18x16x24xf32> to vector<1x16x16x24xf32>
    %53 = vector.shape_cast %52 : vector<1x16x16x24xf32> to vector<256x24xf32>
    %c2_27 = arith.constant 2 : index
    %c0_28 = arith.constant 0 : index
    %c0_29 = arith.constant 0 : index
    %54 = vector.load %arg4[%c2_27, %c0_28, %c0_29] : memref<3x24x8xf32, #tpu.memory_space<vmem>>, vector<1x24x8xf32>
    %55 = vector.shape_cast %54 : vector<1x24x8xf32> to vector<24x8xf32>
    %cst_30 = arith.constant dense<0.000000e+00> : vector<256x8xf32>
    %56 = tpu.matmul %53, %55, %cst_30 {dimension_numbers = #tpu.dot_dimension_numbers<[1], [0], [0], [1], [0, 0, 1, 1], [], []>} : vector<256x24xf32>, vector<24x8xf32>, vector<256x8xf32> -> vector<256x8xf32>
    %57 = arith.addf %51, %56 : vector<256x8xf32>
    %58 = vector.shape_cast %57 : vector<256x8xf32> to vector<1x16x16x8xf32>
    %c0_31 = arith.constant 0 : index
    %c0_32 = arith.constant 0 : index
    %59 = vector.load %arg5[%c0_31, %c0_32] : memref<1x8xf32, #tpu.memory_space<vmem>>, vector<1x8xf32>
    %60 = vector.shape_cast %59 : vector<1x8xf32> to vector<1x1x1x8xf32>
    %61 = vector.broadcast %60 : vector<1x1x1x8xf32> to vector<1x16x16x8xf32>
    %62 = arith.addf %58, %61 : vector<1x16x16x8xf32>
    %c0_33 = arith.constant 0 : index
    %c0_34 = arith.constant 0 : index
    %c0_35 = arith.constant 0 : index
    %c0_36 = arith.constant 0 : index
    %63 = vector.load %arg1[%c0_33, %c0_34, %c0_35, %c0_36] : memref<1x16x16x8xf32, #tpu.memory_space<vmem>>, vector<1x16x16x8xf32>
    %64 = arith.addf %62, %63 : vector<1x16x16x8xf32>
    %cst_37 = arith.constant 0.000000e+00 : f32
    %65 = vector.broadcast %cst_37 : f32 to vector<1x16x16x8xf32>
    %66 = arith.maximumf %64, %65 : vector<1x16x16x8xf32>
    %c0_38 = arith.constant 0 : index
    %c0_39 = arith.constant 0 : index
    %c0_40 = arith.constant 0 : index
    %c0_41 = arith.constant 0 : index
    %67 = vector.load %arg6[%c0_38, %c0_39, %c0_40, %c0_41] : memref<1x16x16x8xf32, #tpu.memory_space<vmem>>, vector<1x16x16x8xf32>
    tpu.vector_store %arg6[%c0_38, %c0_39, %c0_40, %c0_41], %66 {strides = array<i32>} : memref<1x16x16x8xf32, #tpu.memory_space<vmem>>, vector<1x16x16x8xf32>,
    return
  }
  func.func @transform_0(%arg0: i32) -> (i32, i32, i32, i32) {
    %c0_i32 = arith.constant 0 : i32
    %c0_i32_0 = arith.constant 0 : i32
    %c0_i32_1 = arith.constant 0 : i32
    %c0_i32_2 = arith.constant 0 : i32
    return %arg0, %c0_i32, %c0_i32_0, %c0_i32_1 : i32, i32, i32, i32
  }
  func.func @transform_1(%arg0: i32) -> (i32, i32, i32) {
    %c0_i32 = arith.constant 0 : i32
    %c0_i32_0 = arith.constant 0 : i32
    %c0_i32_1 = arith.constant 0 : i32
    %c0_i32_2 = arith.constant 0 : i32
    return %c0_i32, %c0_i32_0, %c0_i32_1 : i32, i32, i32
  }
  func.func @transform_2(%arg0: i32) -> (i32, i32) {
    %c0_i32 = arith.constant 0 : i32
    %c0_i32_0 = arith.constant 0 : i32
    %c0_i32_1 = arith.constant 0 : i32
    return %c0_i32, %c0_i32_0 : i32, i32
  }
  func.func @transform_3(%arg0: i32) -> (i32, i32, i32) {
    %c0_i32 = arith.constant 0 : i32
    %c0_i32_0 = arith.constant 0 : i32
    %c0_i32_1 = arith.constant 0 : i32
    %c0_i32_2 = arith.constant 0 : i32
    return %c0_i32, %c0_i32_0, %c0_i32_1 : i32, i32, i32
  }
  func.func @transform_4(%arg0: i32) -> (i32, i32) {
    %c0_i32 = arith.constant 0 : i32
    %c0_i32_0 = arith.constant 0 : i32
    %c0_i32_1 = arith.constant 0 : i32
    return %c0_i32, %c0_i32_0 : i32, i32
  }
  func.func @transform_5(%arg0: i32) -> (i32, i32, i32, i32) {
    %c0_i32 = arith.constant 0 : i32
    %c0_i32_0 = arith.constant 0 : i32
    %c0_i32_1 = arith.constant 0 : i32
    %c0_i32_2 = arith.constant 0 : i32
    return %arg0, %c0_i32, %c0_i32_0, %c0_i32_1 : i32, i32, i32, i32
  }
}

</mosaic_0001>

<bundles_post_ra>
// kernel: tpu_custom_call.1
= control target key start
LH: loop header
LB: loop body
LE: loop exit
PB: predicated region body
PF: predicated region fallthrough
CT: control target
= control target key end

     0   :  { %s2737_s18 = smov 0   ;;  %s4181_s0 = inlined_call_operand.vmem [shape: f32[2,16,16,8], index: 0, kind: input, shape index: {}]   ;;  %s4182_s1 = inlined_call_operand.vmem [shape: f32[3,24,8], index: 1, kind: input, shape index: {}]   ;;  %s4183_s2 = inlined_call_operand.vmem [shape: f32[1,8], index: 2, kind: input, shape index: {}]   ;;  %s4184_s3 = inlined_call_operand.vmem [shape: f32[3,24,8], index: 3, kind: input, shape index: {}]   ;;  %s4185_s4 = inlined_call_operand.vmem [shape: f32[1,8], index: 4, kind: input, shape index: {}]   ;;  %s4186_s5 = inlined_call_operand.vmem [shape: f32[2,16,16,8], index: 5, kind: output, shape index: {}]  }
   0x1 LB: > { %s2436_s19 = sadd.s32 4294967295, %s2702_s18   ;;  %p2440_p0 = scmp.ge.s32.totalorder %s2702_s18, 1  ;;  %s2702_s18 = sphi %s2737_s18, %s15_s18  }
   0x2   : > { %p187_p1 = scmp.lt.s32.totalorder %s2702_s18, 3 }
   0x4   : > { %p188_p2 = pnand %p2440_p0, %p187_p1 }
   0x5   : > { %p215_p3 = scmp.lt.s32.totalorder (!%p188_p2), %s2436_s19, 1  ;;  %s2704_s24 = smov (!%p188_p2), 8  }
   0x6   : > { %191 = sbr.rel (%p188_p2) target bundleno = 932 (0x3a4), region = 40  ;;  %s2705_s25 = smov (!%p188_p2), 16  }
   0xb   : > { %s4188_s19 = smov (!%p215_p3, %s2436_s19), 1  ;;  %vm386_vm0 = vcmask 1046528   ;;  %v2447_v55 = vld [vmem:[%s4182_s1 + $0x28] sm:$0xff]  ;;  %v2446_v59 = vld [vmem:[%s4182_s1 + $0x20] sm:$0xff]  ;;  %v2445_v60 = vld [vmem:[%s4182_s1 + $0x18] sm:$0xff]  ;;  %vm289_vm1 = vcmask 1040384  }
   0xc   : > { %s2643_s20 = sshll.u32 %s4188_s19, 8  ;;  %2645 = vmatpush.msra.mxu2 %v2447_v55  ;;  %858 = vmatpush.msra.mxu0 %v2447_v55  ;;  %v2512_v62 = vld [vmem:[%s4182_s1 + $0x40] sm:$0xff]  ;;  %vm675_vm2 = vcmask 64512   ;;  %vm708_vm3 = vcmask 130048   ;;  %vm748_vm4 = vcmask 195584  }
   0xd   : > { %s2753_s23 = scalar_lea.vmem %s4181_s0, %s2643_s20  ;;  %s3927_s28 = scalar_lea.vmem %s4186_s5, %s2643_s20 }
   0xe   : > { %v2756_v0 = vld [vmem:[%s2753_s23 + $0x88] sm:$0xff]  ;;  %v2759_v1 = vld [vmem:[%s2753_s23 + $0x80] sm:$0xff]  ;;  %v2768_v4 = vld [vmem:[%s2753_s23 + $0x90] sm:$0xff]  ;;  %2646 = vmatpush.msra.mxu2 %v2446_v59  ;;  %859 = vmatpush.msra.mxu0 %v2446_v59 }
   0xf   : > { %501 = vrot.lane.b32.xlu1 %v2756_v0, %s2704_s24  ;;  %499 = vrot.lane.b32.xlu0 %v2759_v1, %s2704_s24  ;;  %v412_v2 = vrot.slane %v2756_v0, 1  ;;  %v411_v3 = vrot.slane %v2759_v1, 1  ;;  %v2771_v5 = vld [vmem:[%s2753_s23 + $0x98] sm:$0xff]  ;;  %v414_v6 = vrot.slane %v2768_v4, 1  ;;  %v2785_v12 = vld [vmem:[%s2753_s23 + $0xa8] sm:$0xff] }
  0x10   : > { %503 = vrot.lane.b32.xlu2 %v2768_v4, %s2704_s24  ;;  %v415_v9 = vrot.slane %v2771_v5, 1  ;;  %v2788_v13 = vld [vmem:[%s2753_s23 + $0xa0] sm:$0xff]  ;;  %v418_v15 = vrot.slane %v2785_v12, 1  ;;  %v2799_v17 = vld [vmem:[%s2753_s23 + $0xb0] sm:$0xff]  ;;  %v2802_v18 = vld [vmem:[%s2753_s23 + $0xb8] sm:$0xff]  ;;  %2647 = vmatpush.msra.mxu2 %v2445_v60 }
  0x11   : > { %v459_v7 = vsel %vm386_vm0, %v412_v2, 0.0  ;;  %v413_v8 = vsel %vm386_vm0, %v411_v3, %v412_v2  ;;  %v417_v14 = vrot.slane %v2788_v13, 1  ;;  %v420_v20 = vrot.slane %v2799_v17, 1  ;;  %v2816_v23 = vld [vmem:[%s2753_s23 + $0xc0] sm:$0xff]  ;;  %v2819_v24 = vld [vmem:[%s2753_s23 + $0xc8] sm:$0xff]  ;;  %v2833_v30 = vld [vmem:[%s2753_s23 + $0xd8] sm:$0xff]  ;;  %860 = vmatpush.msra.mxu0 %v2445_v60 }
  0x12   : > { %v416_v10 = vsel %vm386_vm0, %v414_v6, %v415_v9  ;;  %v460_v11 = vsel %vm386_vm0, %v415_v9, 0.0  ;;  %v461_v19 = vsel %vm386_vm0, %v418_v15, 0.0  ;;  %v421_v21 = vrot.slane %v2802_v18, 1  ;;  %v2836_v31 = vld [vmem:[%s2753_s23 + $0xd0] sm:$0xff]  ;;  %v2847_v35 = vld [vmem:[%s2753_s23 + $0xe0] sm:$0xff]  ;;  %v2850_v36 = vld [vmem:[%s2753_s23 + $0xe8] sm:$0xff]  ;;  %1091 = vmatpush.msrb.mxu2 %v2512_v62 }
  0x13   : > { %v419_v16 = vsel %vm386_vm0, %v417_v14, %v418_v15  ;;  %v423_v25 = vrot.slane %v2816_v23, 1  ;;  %v424_v27 = vrot.slane %v2819_v24, 1  ;;  %v426_v32 = vrot.slane %v2836_v31, 1  ;;  %v2864_v41 = vld [vmem:[%s2753_s23 + $0xf0] sm:$0xff]  ;;  %v2867_v42 = vld [vmem:[%s2753_s23 + $0xf8] sm:$0xff]  ;;  %v2892_v52 = vld [vmem:[%s2753_s23] sm:$0xff] }
  0x14   : > { %v422_v22 = vsel %vm386_vm0, %v420_v20, %v421_v21  ;;  %v462_v26 = vsel %vm386_vm0, %v421_v21, 0.0  ;;  %v427_v33 = vrot.slane %v2833_v30, 1  ;;  %v429_v38 = vrot.slane %v2847_v35, 1  ;;  %v2881_v48 = vld [vmem:[%s2753_s23 + $0x10] sm:$0xff]  ;;  %v2884_v49 = vld [vmem:[%s2753_s23 + $0x18] sm:$0xff]  ;;  %v2895_v53 = vld [vmem:[%s2753_s23 + $0x8] sm:$0xff] }
  0x15   : > { %v425_v28 = vsel %vm386_vm0, %v423_v25, %v424_v27  ;;  %v463_v29 = vsel %vm386_vm0, %v424_v27, 0.0  ;;  %v430_v39 = vrot.slane %v2850_v36, 1  ;;  %v432_v43 = vrot.slane %v2864_v41, 1  ;;  %v2926_v2 = vld [vmem:[%s2753_s23 + $0x20] sm:$0xff]  ;;  %v2929_v3 = vld [vmem:[%s2753_s23 + $0x28] sm:$0xff]  ;;  %v2947_v15 = vld [vmem:[%s2753_s23 + $0x30] sm:$0xff] }
  0x16   : > { %v428_v34 = vsel %vm386_vm0, %v426_v32, %v427_v33  ;;  %v464_v37 = vsel %vm386_vm0, %v427_v33, 0.0  ;;  %v433_v45 = vrot.slane %v2867_v42, 1  ;;  %v390_v50 = vrot.slane %v2881_v48, 1  ;;  %v2997_v55 = vld [vmem:[%s2753_s23 + $0x50] sm:$0xff] }
  0x17   : > { %613 = vrot.lane.b32.xlu1 %v459_v7, %s2705_s25  ;;  %611 = vrot.lane.b32.xlu0 %v413_v8, %s2705_s25  ;;  %v431_v40 = vsel %vm386_vm0, %v429_v38, %v430_v39  ;;  %v465_v44 = vsel %vm386_vm0, %v430_v39, 0.0  ;;  %v391_v51 = vrot.slane %v2884_v49, 1  ;;  %v387_v54 = vrot.slane %v2892_v52, 1 }
  0x18   : > { %615 = vrot.lane.b32.xlu2 %v416_v10, %s2705_s25  ;;  %v434_v46 = vsel %vm386_vm0, %v432_v43, %v433_v45  ;;  %v466_v47 = vsel %vm386_vm0, %v433_v45, 0.0  ;;  %v388_v57 = vrot.slane %v2895_v53, 1  ;;  %v393_v6 = vrot.slane %v2926_v2, 1 }
  0x19   : > { %v392_v56 = vsel %vm386_vm0, %v390_v50, %v391_v51  ;;  %v452_v63 = vsel %vm386_vm0, %v391_v51, 0.0  ;;  %v394_v9 = vrot.slane %v2929_v3, 1  ;;  %v314_v25 = vrot.slane %v2759_v1, 7 }
  0x1a   : > { %v389_v58 = vsel %vm386_vm0, %v387_v54, %v388_v57  ;;  %v451_v8 = vsel %vm386_vm0, %v388_v57, 0.0  ;;  %v315_v1 = vrot.slane %v2756_v0, 7  ;;  %v317_v50 = vrot.slane %v2768_v4, 7  ;;  %v2511_v4 = vld [vmem:[%s4182_s1 + $0x38] sm:$0xff] }
  0x1b   : > { %v395_v10 = vsel %vm386_vm0, %v393_v6, %v394_v9  ;;  %v453_v14 = vsel %vm386_vm0, %v394_v9, 0.0  ;;  %v378_v32 = vsel %vm289_vm1, 0.0, %v314_v25  ;;  %v402_v57 = vrot.slane %v2997_v55, 1  ;;  %1092 = vmatpush.msrb.mxu2 %v2511_v4  ;;  %v3019_v6 = vld [vmem:[%s2753_s23 + $0x78] sm:$0xff] }
  0x1c   : > { %v379_v60 = vsel %vm289_vm1, 0.0, %v317_v50  ;;  %v323_v4 = vrot.slane %v2799_v17, 7 }
  0x1f   : > { %617 = vrot.lane.b32.xlu1 %v460_v11, %s2705_s25  ;;  %505 = vrot.lane.b32.xlu0 %v2771_v5, %s2704_s24 }
  0x20   : > { %507 = vrot.lane.b32.xlu2 %v2788_v13, %s2704_s24 }
  0x27   : > { %509 = vrot.lane.b32.xlu1 %v2785_v12, %s2704_s24  ;;  %619 = vrot.lane.b32.xlu0 %v419_v16, %s2705_s25  ;;  %v2950_v16 = vld [vmem:[%s2753_s23 + $0x38] sm:$0xff] }
  0x28   : > { %621 = vrot.lane.b32.xlu2 %v461_v19, %s2705_s25  ;;  %v396_v19 = vrot.slane %v2947_v15, 1  ;;  %v397_v20 = vrot.slane %v2950_v16, 1 }
  0x2a   : > { %v398_v27 = vsel %vm386_vm0, %v396_v19, %v397_v20  ;;  %v454_v33 = vsel %vm386_vm0, %v397_v20, 0.0  ;;  %v409_v19 = vrot.slane %v3019_v6, 1 }
  0x2f   : > { %623 = vrot.lane.b32.xlu1 %v422_v22, %s2705_s25  ;;  %511 = vrot.lane.b32.xlu0 %v2799_v17, %s2704_s24 }
  0x30   : > { %513 = vrot.lane.b32.xlu2 %v2802_v18, %s2704_s24 }
  0x37   : > { %515 = vrot.lane.b32.xlu1 %v2816_v23, %s2704_s24  ;;  %625 = vrot.lane.b32.xlu0 %v462_v26, %s2705_s25 }
  0x38   : > { %627 = vrot.lane.b32.xlu2 %v425_v28, %s2705_s25  ;;  %v2964_v28 = vld [vmem:[%s2753_s23 + $0x40] sm:$0xff] }
  0x3f   : > { %629 = vrot.lane.b32.xlu1 %v463_v29, %s2705_s25  ;;  %517 = vrot.lane.b32.xlu0 %v2819_v24, %s2704_s24  ;;  %v2967_v29 = vld [vmem:[%s2753_s23 + $0x48] sm:$0xff] }
  0x40   : > { %519 = vrot.lane.b32.xlu2 %v2836_v31, %s2704_s24 }
  0x47   : > { %521 = vrot.lane.b32.xlu1 %v2833_v30, %s2704_s24  ;;  %631 = vrot.lane.b32.xlu0 %v428_v34, %s2705_s25  ;;  %v399_v34 = vrot.slane %v2964_v28, 1 }
  0x48   : > { %633 = vrot.lane.b32.xlu2 %v464_v37, %s2705_s25  ;;  %v400_v37 = vrot.slane %v2967_v29, 1 }
  0x4a   : > { %v401_v45 = vsel %vm386_vm0, %v399_v34, %v400_v37  ;;  %v455_v62 = vsel %vm386_vm0, %v400_v37, 0.0 }
  0x4f   : > { %635 = vrot.lane.b32.xlu1 %v431_v40, %s2705_s25  ;;  %523 = vrot.lane.b32.xlu0 %v2847_v35, %s2704_s24 }
  0x50   : > { %525 = vrot.lane.b32.xlu2 %v2850_v36, %s2704_s24 }
  0x57   : > { %527 = vrot.lane.b32.xlu1 %v2864_v41, %s2704_s24  ;;  %637 = vrot.lane.b32.xlu0 %v465_v44, %s2705_s25  ;;  %v316_v44 = vsel %vm289_vm1, %v314_v25, %v315_v1 }
  0x58   : > { %639 = vrot.lane.b32.xlu2 %v434_v46, %s2705_s25 }
  0x5f   : > { %641 = vrot.lane.b32.xlu1 %v466_v47, %s2705_s25  ;;  %529 = vrot.lane.b32.xlu0 %v2867_v42, %s2704_s24  ;;  %v2993_v47 = vld [vmem:[%s2753_s23 + $0x58] sm:$0xff] }
  0x60   : > { %471 = vrot.lane.b32.xlu2 %v2881_v48, %s2704_s24 }
  0x67   : > { %583 = vrot.lane.b32.xlu0 %v392_v56, %s2705_s25  ;;  %467 = vrot.lane.b32.xlu1 %v2892_v52, %s2704_s24 }
  0x68   : > { %579 = vrot.lane.b32.xlu2 %v389_v58, %s2705_s25  ;;  %v403_v58 = vrot.slane %v2993_v47, 1 }
  0x6a   : > { %v2916_v61 = vpop.permute.xlu2 %503  ;;  %v404_v9 = vsel %vm386_vm0, %v402_v57, %v403_v58  ;;  %v456_v37 = vsel %vm386_vm0, %v403_v58, 0.0 }
  0x6f   : > { %473 = vrot.lane.b32.xlu0 %v2884_v49, %s2704_s24  ;;  %585 = vrot.lane.b32.xlu1 %v452_v63, %s2705_s25  ;;  %v3016_v63 = vld [vmem:[%s2753_s23 + $0x70] sm:$0xff] }
  0x70   : > { %469 = vrot.lane.b32.xlu2 %v2895_v53, %s2704_s24 }
  0x72   : > { %v2934_v7 = vpop.permute.xlu2 %615 }
  0x77   : > { %581 = vrot.lane.b32.xlu0 %v451_v8, %s2705_s25  ;;  %475 = vrot.lane.b32.xlu1 %v2926_v2, %s2704_s24  ;;  %v318_v8 = vrot.slane %v2771_v5, 7 }
  0x78   : > { %587 = vrot.lane.b32.xlu2 %v395_v10, %s2705_s25  ;;  %v694_v10 = vsel %vm675_vm2, %v379_v60, %v2916_v61 }
  0x79   : > { %v319_v5 = vsel %vm289_vm1, %v317_v50, %v318_v8 }
  0x7a   : > { %v2943_v11 = vpop.permute.xlu2 %507 }
  0x7f   : > { %477 = vrot.lane.b32.xlu0 %v2929_v3, %s2704_s24  ;;  %589 = vrot.lane.b32.xlu1 %v453_v14, %s2705_s25  ;;  %v408_v14 = vrot.slane %v3016_v63, 1 }
  0x80   : > { %479 = vrot.lane.b32.xlu2 %v2947_v15, %s2704_s24 }
  0x81   : > { %v502_v21 = vpop.permute.xlu1 %501  ;;  %v500_v22 = vpop.permute.xlu0 %499  ;;  %v410_v25 = vsel %vm386_vm0, %v408_v14, %v409_v19 }
  0x82   : > { %v2960_v26 = vpop.permute.xlu2 %621  ;;  %v692_v38 = vsel %vm675_vm2, %v378_v32, %v500_v22  ;;  %v693_v46 = vsel %vm675_vm2, %v316_v44, %v502_v21  ;;  %v3034_v22 = vsel %vm708_vm3, %v694_v10, %v2934_v7  ;;  %v320_v32 = vrot.slane %v2788_v13, 7 }
  0x83   : > { %v381_v10 = vsel %vm289_vm1, 0.0, %v323_v4 }
  0x84   : > { %v380_v34 = vsel %vm289_vm1, 0.0, %v320_v32 }
  0x87   : > { %591 = vrot.lane.b32.xlu0 %v398_v27, %s2705_s25  ;;  %481 = vrot.lane.b32.xlu1 %v2950_v16, %s2704_s24 }
  0x88   : > { %593 = vrot.lane.b32.xlu2 %v454_v33, %s2705_s25 }
  0x89   : > { %v614_v39 = vpop.permute.xlu1 %613  ;;  %v612_v40 = vpop.permute.xlu0 %611 }
  0x8a   : > { %v2980_v43 = vsel %vm708_vm3, %v692_v38, %v612_v40  ;;  %v2984_v0 = vpop.permute.xlu2 %513  ;;  %v3002_v56 = vsel %vm708_vm3, %v693_v46, %v614_v39  ;;  %v696_v38 = vsel %vm675_vm2, %v380_v34, %v2943_v11  ;;  %v321_v39 = vrot.slane %v2785_v12, 7  ;;  %v3074_v11 = vld [vmem:[%s2753_s23 + $0x60] sm:$0xff] }
  0x8b   : > { %2464 = vmatmul.msk.f32.vlgmr.msra.gmra.mxu2 %vm748_vm4, %v2980_v43  ;;  %v458_v40 = vsel %vm386_vm0, %v409_v19, 0.0 }
  0x8c   : > { %v322_v50 = vsel %vm289_vm1, %v320_v32, %v321_v39  ;;  %v2510_v32 = vld [vmem:[%s4182_s1 + $0x30] sm:$0xff] }
  0x8d   : > { %1093 = vmatpush.msrb.mxu2 %v2510_v32 }
  0x8f   : > { %483 = vrot.lane.b32.xlu0 %v2964_v28, %s2704_s24  ;;  %595 = vrot.lane.b32.xlu1 %v401_v45, %s2705_s25 }
  0x90   : > { %485 = vrot.lane.b32.xlu2 %v2967_v29, %s2704_s24 }
  0x91   : > { %v618_v51 = vpop.permute.xlu1 %617  ;;  %v506_v54 = vpop.permute.xlu0 %505 }
  0x92   : > { %v3008_v59 = vpop.permute.xlu2 %627  ;;  %v695_v27 = vsel %vm675_vm2, %v319_v5, %v506_v54  ;;  %v405_v54 = vrot.slane %v3074_v11, 1 }
  0x93   : > { %2465 = vmatmul.msk.f32.gmra.mxu2 %vm748_vm4, %v3002_v56  ;;  %v3047_v33 = vsel %vm708_vm3, %v695_v27, %v618_v51  ;;  %v3077_v51 = vld [vmem:[%s2753_s23 + $0x68] sm:$0xff]  ;;  %v743_v27 = vld [vmem:[%s4182_s1 + $0x10] sm:$0xff] }
  0x94   : > { %v406_v57 = vrot.slane %v3077_v51, 1  ;;  %974 = vmatpush.msra.mxu1 %v743_v27  ;;  %2648 = vmatpush.msra.mxu3 %v743_v27 }
  0x96   : > { %v407_v60 = vsel %vm386_vm0, %v405_v54, %v406_v57  ;;  %v457_v14 = vsel %vm386_vm0, %v406_v57, 0.0 }
  0x97   : > { %597 = vrot.lane.b32.xlu0 %v455_v62, %s2705_s25  ;;  %487 = vrot.lane.b32.xlu1 %v2997_v55, %s2704_s24 }
  0x98   : > { %599 = vrot.lane.b32.xlu2 %v404_v9, %s2705_s25 }
  0x99   : > { %v510_v20 = vpop.permute.xlu1 %509  ;;  %v620_v21 = vpop.permute.xlu0 %619 }
  0x9a   : > { %v3038_v61 = vpop.permute.xlu2 %519  ;;  %v3065_v44 = vsel %vm708_vm3, %v696_v38, %v620_v21  ;;  %v697_v58 = vsel %vm675_vm2, %v322_v50, %v510_v20  ;;  %v324_v20 = vrot.slane %v2802_v18, 7  ;;  %v742_v18 = vld [vmem:[%s4182_s1 + $0x8] sm:$0xff] }
  0x9b   : > { %2466 = vmatmul.msk.f32.gmra.mxu2 %vm748_vm4, %v3034_v22  ;;  %v3089_v62 = vsel %vm708_vm3, %v697_v58, %v2960_v26  ;;  %975 = vmatpush.msra.mxu1 %v742_v18 }
  0x9c   : > { %2649 = vmatpush.msra.mxu3 %v742_v18 }
  0x9f   : > { %495 = vrot.lane.b32.xlu0 %v3016_v63, %s2704_s24  ;;  %607 = vrot.lane.b32.xlu1 %v410_v25, %s2705_s25  ;;  %v325_v25 = vsel %vm289_vm1, %v323_v4, %v324_v20 }
  0xa0   : > { %489 = vrot.lane.b32.xlu2 %v2993_v47, %s2704_s24 }
  0xa1   : > { %v624_v7 = vpop.permute.xlu1 %623  ;;  %v512_v1 = vpop.permute.xlu0 %511 }
  0xa2   : > { %v3054_v13 = vpop.permute.xlu2 %633  ;;  %v698_v19 = vsel %vm675_vm2, %v381_v10, %v512_v1  ;;  %v326_v1 = vrot.slane %v2816_v23, 7  ;;  %v2706_v23 = vmov 0.0  }
  0xa3   : > { %2467 = vmatmul.msk.f32.gmra.mxu2 %vm748_vm4, %v3047_v33  ;;  %v3103_v26 = vsel %vm708_vm3, %v698_v19, %v624_v7  ;;  %v699_v7 = vsel %vm675_vm2, %v325_v25, %v2984_v0  ;;  %v290_v25 = vrot.slane %v2892_v52, 7 }
  0xa4   : > { %v382_v50 = vsel %vm289_vm1, 0.0, %v326_v1 }
  0xa7   : > { %497 = vrot.lane.b32.xlu1 %v3019_v6, %s2704_s24  ;;  %601 = vrot.lane.b32.xlu0 %v456_v37, %s2705_s25 }
  0xa8   : > { %609 = vrot.lane.b32.xlu2 %v458_v40, %s2705_s25  ;;  %v741_v40 = vld [vmem:[%s4182_s1] sm:$0xff] }
  0xa9   : > { %v516_v45 = vpop.permute.xlu1 %515  ;;  %v626_v46 = vpop.permute.xlu0 %625  ;;  %976 = vmatpush.msra.mxu1 %v741_v40  ;;  %2650 = vmatpush.msra.mxu3 %v741_v40  ;;  %v291_v40 = vrot.slane %v2895_v53, 7 }
  0xaa   : > { %v3071_v12 = vpop.permute.xlu2 %525  ;;  %v3123_v37 = vsel %vm708_vm3, %v699_v7, %v626_v46  ;;  %977 = vmatmul.f32.vlgmr.msra.gmra.mxu1 %v2706_v23  ;;  %v700_v0 = vsel %vm675_vm2, %v382_v50, %v516_v45  ;;  %v327_v46 = vrot.slane %v2819_v24, 7  ;;  %v329_v45 = vrot.slane %v2836_v31, 7 }
  0xab   : > { %2468 = vmatmul.msk.f32.gmra.mxu2 %vm748_vm4, %v3065_v44  ;;  %v3136_v54 = vsel %vm708_vm3, %v700_v0, %v3008_v59  ;;  %v330_v31 = vrot.slane %v2833_v30, 7 }
  0xac   : > { %v383_v19 = vsel %vm289_vm1, 0.0, %v329_v45 }
  0xad   : > { %v331_v7 = vsel %vm289_vm1, %v329_v45, %v330_v31 }
  0xaf   : > { %491 = vrot.lane.b32.xlu0 %v3074_v11, %s2704_s24  ;;  %603 = vrot.lane.b32.xlu1 %v407_v60, %s2705_s25  ;;  %v328_v60 = vsel %vm289_vm1, %v326_v1, %v327_v46 }
  0xb0   : > { %493 = vrot.lane.b32.xlu2 %v3077_v51, %s2704_s24 }
  0xb1   : > { %v630_v8 = vpop.permute.xlu1 %629  ;;  %v518_v9 = vpop.permute.xlu0 %517 }
  0xb2   : > { %v3096_v17 = vpop.permute.xlu2 %639  ;;  %980 = vmatmul.f32.gmra.mxu1 %v2706_v23  ;;  %v701_v10 = vsel %vm675_vm2, %v328_v60, %v518_v9  ;;  %v702_v9 = vsel %vm675_vm2, %v383_v19, %v3038_v61 }
  0xb3   : > { %2469 = vmatmul.msk.f32.gmra.mxu2 %vm748_vm4, %v3089_v62  ;;  %v3147_v24 = vsel %vm708_vm3, %v701_v10, %v630_v8  ;;  %v370_v8 = vsel %vm289_vm1, 0.0, %v290_v25 }
  0xb7   : > { %605 = vrot.lane.b32.xlu0 %v457_v14, %s2705_s25 }
  0xb9   : > { %v522_v21 = vpop.permute.xlu1 %521  ;;  %v632_v5 = vpop.permute.xlu0 %631 }
  0xba   : > { %v3120_v34 = vpop.permute.xlu2 %471  ;;  %v3162_v27 = vsel %vm708_vm3, %v702_v9, %v632_v5  ;;  %v703_v30 = vsel %vm675_vm2, %v331_v7, %v522_v21  ;;  %v332_v5 = vrot.slane %v2847_v35, 7  ;;  %v333_v21 = vrot.slane %v2850_v36, 7 }
  0xbb   : > { %2470 = vmatmul.msk.f32.gmra.mxu2 %vm748_vm4, %v3103_v26  ;;  %v3176_v50 = vsel %vm708_vm3, %v703_v30, %v3054_v13  ;;  %v293_v35 = vrot.slane %v2881_v48, 7 }
  0xbc   : > { %v384_v60 = vsel %vm289_vm1, 0.0, %v332_v5  ;;  %v334_v31 = vsel %vm289_vm1, %v332_v5, %v333_v21 }
  0xbd   : > { %v705_v36 = vsel %vm675_vm2, %v334_v31, %v3071_v12 }
  0xc1   : > { %v636_v38 = vpop.permute.xlu1 %635  ;;  %v524_v39 = vpop.permute.xlu0 %523 }
  0xc2   : > { %v580_v57 = vpop.permute.xlu2 %579  ;;  %v704_v10 = vsel %vm675_vm2, %v384_v60, %v524_v39  ;;  %v294_v39 = vrot.slane %v2884_v49, 7 }
  0xc3   : > { %2471 = vmatmul.msk.f32.gmra.mxu2 %vm748_vm4, %v3123_v37  ;;  %v3187_v13 = vsel %vm708_vm3, %v704_v10, %v636_v38  ;;  %v335_v38 = vrot.slane %v2864_v41, 7 }
  0xc4   : > { %v295_v12 = vsel %vm289_vm1, %v293_v35, %v294_v39 }
  0xc5   : > { %v385_v30 = vsel %vm289_vm1, 0.0, %v335_v38 }
  0xc9   : > { %v3138_v58 = vpop.permute.xlu1 %527  ;;  %v638_v4 = vpop.permute.xlu0 %637 }
  0xca   : > { %v470_v20 = vpop.permute.xlu2 %469  ;;  %v706_v41 = vsel %vm675_vm2, %v385_v30, %v3138_v58 }
  0xcb   : > { %2472 = vmatmul.msk.f32.gmra.mxu2 %vm748_vm4, %v3136_v54  ;;  %v3222_v5 = vsel %vm708_vm3, %v706_v41, %v3096_v17  ;;  %v297_v17 = vrot.slane %v2929_v3, 7 }
  0xd1   : > { %v3149_v59 = vpop.permute.xlu1 %641  ;;  %v3151_v14 = vpop.permute.xlu0 %529 }
  0xd2   : > { %v588_v61 = vpop.permute.xlu2 %587 }
  0xd3   : > { %2473 = vmatmul.msk.f32.gmra.mxu2 %vm748_vm4, %v3147_v24 }
  0xd9   : > { %v584_v18 = vpop.permute.xlu0 %583  ;;  %v468_v32 = vpop.permute.xlu1 %467 }
  0xda   : > { %v676_v1 = vsel %vm675_vm2, %v370_v8, %v468_v32  ;;  %v480_v53 = vpop.permute.xlu2 %479  ;;  %v371_v8 = vsel %vm289_vm1, 0.0, %v293_v35  ;;  %v3204_v32 = vsel %vm708_vm3, %v705_v36, %v638_v4  ;;  %v336_v4 = vrot.slane %v2867_v42, 7 }
  0xdb   : > { %2474 = vmatmul.msk.f32.gmra.mxu2 %vm748_vm4, %v3162_v27  ;;  %v709_v52 = vsel %vm708_vm3, %v676_v1, %v580_v57  ;;  %v292_v57 = vsel %vm289_vm1, %v290_v25, %v291_v40  ;;  %v678_v48 = vsel %vm675_vm2, %v371_v8, %v3120_v34  ;;  %v296_v34 = vrot.slane %v2926_v2, 7 }
  0xdc   : > { %2448 = vmatmul.msk.f32.vlgmr.msra.gmra.mxu0 %vm748_vm4, %v709_v52  ;;  %2480 = vmatmul.msk.f32.gmra.mxu1 %vm748_vm4, %v709_v52  ;;  %v677_v45 = vsel %vm675_vm2, %v292_v57, %v470_v20  ;;  %v711_v20 = vsel %vm708_vm3, %v678_v48, %v584_v18  ;;  %v337_v2 = vsel %vm289_vm1, %v335_v38, %v336_v4  ;;  %v311_v8 = vrot.slane %v3016_v63, 7 }
  0xdd   : > { %v372_v57 = vsel %vm289_vm1, 0.0, %v296_v34  ;;  %v707_v58 = vsel %vm675_vm2, %v337_v2, %v3151_v14  ;;  %v298_v35 = vsel %vm289_vm1, %v296_v34, %v297_v17  ;;  %v299_v14 = vrot.slane %v2947_v15, 7 }
  0xde   : > { %v300_v36 = vrot.slane %v2950_v16, 7  ;;  %v377_v38 = vsel %vm289_vm1, 0.0, %v311_v8  ;;  %v312_v16 = vrot.slane %v3019_v6, 7 }
  0xe0   : > { %v301_v30 = vsel %vm289_vm1, %v299_v14, %v300_v36 }
  0xe1   : > { %v474_v0 = vpop.permute.xlu0 %473  ;;  %v586_v46 = vpop.permute.xlu1 %585 }
  0xe2   : > { %v3206_v7 = vpop.permute.xlu2 %593  ;;  %v679_v49 = vsel %vm675_vm2, %v295_v12, %v474_v0  ;;  %v302_v12 = vrot.slane %v2964_v28, 7 }
  0xe3   : > { %2475 = vmatmul.msk.f32.gmra.mxu2 %vm748_vm4, %v3176_v50  ;;  %v712_v18 = vsel %vm708_vm3, %v679_v49, %v586_v46  ;;  %v313_v49 = vsel %vm289_vm1, %v311_v8, %v312_v16 }
  0xe4   : > { %v374_v6 = vsel %vm289_vm1, 0.0, %v302_v12 }
  0xe9   : > { %v582_v19 = vpop.permute.xlu0 %581  ;;  %v476_v9 = vpop.permute.xlu1 %475 }
  0xea   : > { %v710_v25 = vsel %vm708_vm3, %v677_v45, %v582_v19  ;;  %v3225_v10 = vpop.permute.xlu2 %485  ;;  %v680_v42 = vsel %vm675_vm2, %v372_v57, %v476_v9  ;;  %v3240_v45 = vsel %vm708_vm3, %v707_v58, %v3149_v59  ;;  %v373_v59 = vsel %vm289_vm1, 0.0, %v299_v14 }
  0xeb   : > { %2449 = vmatmul.msk.f32.gmra.mxu0 %vm748_vm4, %v710_v25  ;;  %2476 = vmatmul.msk.f32.gmra.mxu2 %vm748_vm4, %v3187_v13  ;;  %v713_v0 = vsel %vm708_vm3, %v680_v42, %v588_v61 }
  0xec   : > { %2481 = vmatmul.msk.f32.gmra.mxu1 %vm748_vm4, %v710_v25  ;;  %v682_v25 = vsel %vm675_vm2, %v373_v59, %v480_v53 }
  0xf1   : > { %v478_v1 = vpop.permute.xlu0 %477  ;;  %v590_v52 = vpop.permute.xlu1 %589 }
  0xf2   : > { %v3245_v19 = vpop.permute.xlu2 %599  ;;  %v681_v3 = vsel %vm675_vm2, %v298_v35, %v478_v1 }
  0xf3   : > { %2450 = vmatmul.msk.f32.gmra.mxu0 %vm748_vm4, %v711_v20  ;;  %2477 = vmatmul.msk.f32.gmra.mxu2 %vm748_vm4, %v3204_v32  ;;  %v714_v61 = vsel %vm708_vm3, %v681_v3, %v590_v52 }
  0xf4   : > { %2482 = vmatmul.msk.f32.gmra.mxu1 %vm748_vm4, %v711_v20 }
  0xf9   : > { %v592_v40 = vpop.permute.xlu0 %591  ;;  %v482_v60 = vpop.permute.xlu1 %481 }
  0xfa   : > { %v490_v15 = vpop.permute.xlu2 %489  ;;  %v715_v39 = vsel %vm708_vm3, %v682_v25, %v592_v40  ;;  %v683_v53 = vsel %vm675_vm2, %v301_v30, %v482_v60 }
  0xfb   : > { %2451 = vmatmul.msk.f32.gmra.mxu0 %vm748_vm4, %v712_v18  ;;  %2478 = vmatmul.msk.f32.gmra.mxu2 %vm748_vm4, %v3222_v5  ;;  %v716_v4 = vsel %vm708_vm3, %v683_v53, %v3206_v7  ;;  %v303_v7 = vrot.slane %v2967_v29, 7  ;;  %v305_v29 = vrot.slane %v2997_v55, 7 }
  0xfc   : > { %2483 = vmatmul.msk.f32.gmra.mxu1 %vm748_vm4, %v712_v18 }
  0xfd   : > { %v304_v42 = vsel %vm289_vm1, %v302_v12, %v303_v7 }
  0xfe   : > { %v685_v17 = vsel %vm675_vm2, %v304_v42, %v3225_v10  ;;  %v306_v10 = vrot.slane %v2993_v47, 7 }
 0x100   : > { %v307_v14 = vsel %vm289_vm1, %v305_v29, %v306_v10 }
 0x101   : > { %v484_v46 = vpop.permute.xlu0 %483  ;;  %v596_v21 = vpop.permute.xlu1 %595 }
 0x102   : > { %v610_v34 = vpop.permute.xlu2 %609  ;;  %v684_v28 = vsel %vm675_vm2, %v374_v6, %v484_v46  ;;  %v375_v46 = vsel %vm289_vm1, 0.0, %v305_v29 }
 0x103   : > { %2452 = vmatmul.msk.f32.gmra.mxu0 %vm748_vm4, %v713_v0  ;;  %2479 = vmatmul.msk.f32.gmra.mxu2 %vm748_vm4, %v3240_v45  ;;  %v717_v2 = vsel %vm708_vm3, %v684_v28, %v596_v21 }
 0x104   : > { %2484 = vmatmul.msk.f32.gmra.mxu1 %vm748_vm4, %v713_v0 }
 0x109   : > { %v598_v9 = vpop.permute.xlu0 %597  ;;  %v488_v31 = vpop.permute.xlu1 %487 }
 0x10a   : > { %v686_v21 = vsel %vm675_vm2, %v375_v46, %v488_v31 }
 0x10b   : > { %2453 = vmatmul.msk.f32.gmra.mxu0 %vm748_vm4, %v714_v61  ;;  %2513 = vmatmul.msk.f32.vlgmr.msrb.gmra.mxu2 %vm748_vm4, %v711_v20  ;;  %v719_v35 = vsel %vm708_vm3, %v686_v21, %v3245_v19 }
 0x10c   : > { %2485 = vmatmul.msk.f32.gmra.mxu1 %vm748_vm4, %v714_v61 }
 0x10e   : > { %v3258_v48 = vpop.f32.mrf.mxu2 }
 0x111   : > { %v496_v1 = vpop.permute.xlu0 %495  ;;  %v608_v52 = vpop.permute.xlu1 %607 }
 0x112   : > { %v690_v20 = vsel %vm675_vm2, %v377_v38, %v496_v1 }
 0x113   : > { %2454 = vmatmul.msk.f32.gmra.mxu0 %vm748_vm4, %v715_v39  ;;  %2514 = vmatmul.msk.f32.gmra.mxu2 %vm748_vm4, %v712_v18  ;;  %v3267_v63 = vsel %vm708_vm3, %v690_v20, %v608_v52 }
 0x114   : > { %2494 = vmatmul.msk.f32.vlgmr.msra.gmra.mxu3 %vm748_vm4, %v3267_v63  ;;  %2486 = vmatmul.msk.f32.gmra.mxu1 %vm748_vm4, %v715_v39 }
 0x116   : > { %v3275_v41 = vpop.f32.mrf.mxu2 }
 0x119   : > { %v498_v18 = vpop.permute.xlu1 %497  ;;  %v602_v3 = vpop.permute.xlu0 %601 }
 0x11a   : > { %v691_v40 = vsel %vm675_vm2, %v313_v49, %v498_v18 }
 0x11b   : > { %2455 = vmatmul.msk.f32.gmra.mxu0 %vm748_vm4, %v716_v4  ;;  %2515 = vmatmul.msk.f32.gmra.mxu2 %vm748_vm4, %v713_v0  ;;  %v3285_v60 = vsel %vm708_vm3, %v691_v40, %v610_v34  ;;  %v718_v0 = vsel %vm708_vm3, %v685_v17, %v598_v9  ;;  %v308_v9 = vrot.slane %v3074_v11, 7  ;;  %v309_v11 = vrot.slane %v3077_v51, 7 }
 0x11c   : > { %2495 = vmatmul.msk.f32.gmra.mxu3 %vm748_vm4, %v3285_v60  ;;  %2487 = vmatmul.msk.f32.gmra.mxu1 %vm748_vm4, %v716_v4 }
 0x11d   : > { %v376_v31 = vsel %vm289_vm1, 0.0, %v308_v9  ;;  %v310_v38 = vsel %vm289_vm1, %v308_v9, %v309_v11 }
 0x11e   : > { %v3292_v57 = vpop.f32.mrf.mxu2 }
 0x121   : > { %v492_v59 = vpop.permute.xlu0 %491  ;;  %v604_v25 = vpop.permute.xlu1 %603 }
 0x122   : > { %v688_v8 = vsel %vm675_vm2, %v376_v31, %v492_v59 }
 0x123   : > { %2456 = vmatmul.msk.f32.gmra.mxu0 %vm748_vm4, %v717_v2  ;;  %2516 = vmatmul.msk.f32.gmra.mxu2 %vm748_vm4, %v714_v61  ;;  %v687_v61 = vsel %vm675_vm2, %v307_v14, %v490_v15  ;;  %v721_v15 = vsel %vm708_vm3, %v688_v8, %v604_v25 }
 0x124   : > { %2496 = vmatmul.msk.f32.gmra.mxu3 %vm748_vm4, %v2980_v43  ;;  %2488 = vmatmul.msk.f32.gmra.mxu1 %vm748_vm4, %v717_v2  ;;  %v720_v19 = vsel %vm708_vm3, %v687_v61, %v602_v3 }
 0x126   : > { %v3304_v58 = vpop.f32.mrf.mxu2 }
 0x127   : > { %v978_v49 = vpop.f32.mrf.mxu1 }
 0x129   : > { %v606_v52 = vpop.permute.xlu0 %605 }
 0x12b   : > { %2457 = vmatmul.msk.f32.gmra.mxu0 %vm748_vm4, %v718_v0  ;;  %2517 = vmatmul.msk.f32.gmra.mxu2 %vm748_vm4, %v715_v39  ;;  %v494_v39 = vpop.permute.xlu2 %493 }
 0x12c   : > { %2497 = vmatmul.msk.f32.gmra.mxu3 %vm748_vm4, %v3002_v56  ;;  %2489 = vmatmul.msk.f32.gmra.mxu1 %vm748_vm4, %v718_v0  ;;  %v689_v1 = vsel %vm675_vm2, %v310_v38, %v494_v39 }
 0x12d   : > { %v722_v51 = vsel %vm708_vm3, %v689_v1, %v606_v52 }
 0x12e   : > { %v3315_v55 = vpop.f32.mrf.mxu2 }
 0x12f   : > { %v981_v18 = vpop.f32.mrf.mxu1 }
 0x133   : > { %2458 = vmatmul.msk.f32.gmra.mxu0 %vm748_vm4, %v719_v35  ;;  %2518 = vmatmul.msk.f32.gmra.mxu2 %vm748_vm4, %v716_v4 }
 0x134   : > { %2498 = vmatmul.msk.f32.gmra.mxu3 %vm748_vm4, %v3034_v22  ;;  %2490 = vmatmul.msk.f32.gmra.mxu1 %vm748_vm4, %v719_v35 }
 0x136   : > { %v3326_v47 = vpop.f32.mrf.mxu2 }
 0x13b   : > { %2459 = vmatmul.msk.f32.gmra.mxu0 %vm748_vm4, %v720_v19  ;;  %2519 = vmatmul.msk.f32.gmra.mxu2 %vm748_vm4, %v717_v2  ;;  %v1773_v2 = vld [vmem:[%s4184_s3 + $0x10] sm:$0xff] }
 0x13c   : > { %2499 = vmatmul.msk.f32.gmra.mxu3 %vm748_vm4, %v3047_v33  ;;  %2491 = vmatmul.msk.f32.gmra.mxu1 %vm748_vm4, %v720_v19 }
 0x13d   : > { %2000 = vmatpush.msrb.mxu0 %v1773_v2 }
 0x13e   : > { %v3337_v36 = vpop.f32.mrf.mxu2 }
 0x143   : > { %2460 = vmatmul.msk.f32.gmra.mxu0 %vm748_vm4, %v721_v15  ;;  %2520 = vmatmul.msk.f32.gmra.mxu2 %vm748_vm4, %v718_v0 }
 0x144   : > { %2500 = vmatmul.msk.f32.gmra.mxu3 %vm748_vm4, %v3065_v44  ;;  %2492 = vmatmul.msk.f32.gmra.mxu1 %vm748_vm4, %v721_v15 }
 0x146   : > { %v3348_v30 = vpop.f32.mrf.mxu2 }
 0x14b   : > { %2461 = vmatmul.msk.f32.gmra.mxu0 %vm748_vm4, %v722_v51  ;;  %2521 = vmatmul.msk.f32.gmra.mxu2 %vm748_vm4, %v719_v35 }
 0x14c   : > { %2501 = vmatmul.msk.f32.gmra.mxu3 %vm748_vm4, %v3089_v62  ;;  %2493 = vmatmul.msk.f32.gmra.mxu1 %vm748_vm4, %v722_v51 }
 0x14e   : > { %v3356_v20 = vpop.f32.mrf.mxu2 }
 0x153   : > { %2462 = vmatmul.msk.f32.gmra.mxu0 %vm748_vm4, %v3267_v63  ;;  %2522 = vmatmul.msk.f32.gmra.mxu2 %vm748_vm4, %v720_v19 }
 0x154   : > { %2502 = vmatmul.msk.f32.gmra.mxu3 %vm748_vm4, %v3103_v26 }
 0x156   : > { %v3363_v16 = vpop.f32.mrf.mxu2 }
 0x159   : > { %v862_v34 = vpop.f32.mrf.mxu0 }
 0x15a   : > { %v979_v0 = vadd.f32 %v978_v49, %v862_v34 }
 0x15b   : > { %2463 = vmatmul.msk.f32.gmra.mxu0 %vm748_vm4, %v3285_v60  ;;  %2523 = vmatmul.msk.f32.gmra.mxu2 %vm748_vm4, %v721_v15 }
 0x15c   : > { %2503 = vmatmul.msk.f32.gmra.mxu3 %vm748_vm4, %v3123_v37 }
 0x15e   : > { %v3370_v53 = vpop.f32.mrf.mxu2 }
 0x163   : > { %2524 = vmatmul.msk.f32.gmra.mxu2 %vm748_vm4, %v722_v51 }
 0x164   : > { %2504 = vmatmul.msk.f32.gmra.mxu3 %vm748_vm4, %v3136_v54 }
 0x166   : > { %v3375_v12 = vpop.f32.mrf.mxu2 }
 0x168   : > { %v865_v6 = vpop.f32.mrf.mxu0 }
 0x169   : > { %v982_v14 = vadd.f32 %v981_v18, %v865_v6 }
 0x16b   : > { %2525 = vmatmul.msk.f32.gmra.mxu2 %vm748_vm4, %v3267_v63  ;;  %v2545_v63 = vld [vmem:[%s4184_s3 + $0x28] sm:$0xff] }
 0x16c   : > { %2505 = vmatmul.msk.f32.gmra.mxu3 %vm748_vm4, %v3147_v24 }
 0x16d   : > { %1887 = vmatpush.msrb.mxu3 %v2545_v63 }
 0x16e   : > { %v3381_v4 = vpop.f32.mrf.mxu2 }
 0x170   : > { %v868_v7 = vpop.f32.mrf.mxu0 }
 0x173   : > { %2526 = vmatmul.msk.f32.gmra.mxu2 %vm748_vm4, %v3285_v60  ;;  %v984_v60 = vpop.f32.mrf.mxu1 }
 0x174   : > { %2506 = vmatmul.msk.f32.gmra.mxu3 %vm748_vm4, %v3162_v27  ;;  %v985_v59 = vadd.f32 %v984_v60, %v868_v7 }
 0x176   : > { %v3387_v40 = vpop.f32.mrf.mxu2 }
 0x178   : > { %v871_v29 = vpop.f32.mrf.mxu0 }
 0x17b   : > { %2527 = vmatmul.msk.f32.gmra.mxu2 %vm748_vm4, %v2980_v43  ;;  %v2610_v43 = vld [vmem:[%s4184_s3 + $0x40] sm:$0xff]  ;;  %v987_v17 = vpop.f32.mrf.mxu1 }
 0x17c   : > { %2507 = vmatmul.msk.f32.gmra.mxu3 %vm748_vm4, %v3176_v50  ;;  %2117 = vmatpush.msrb.mxu1 %v2610_v43  ;;  %v988_v34 = vadd.f32 %v987_v17, %v871_v29  ;;  %v1772_v17 = vld [vmem:[%s4184_s3 + $0x8] sm:$0xff] }
 0x17d   : > { %2001 = vmatpush.msrb.mxu0 %v1772_v17 }
 0x17e   : > { %v3396_v28 = vpop.f32.mrf.mxu2 }
 0x183   : > { %2528 = vmatmul.msk.f32.gmra.mxu2 %vm748_vm4, %v3002_v56  ;;  %v3417_v56 = vld [vmem:[%s4183_s2] ss:$0 sm:$0xff]  ;;  %v990_v35 = vpop.f32.mrf.mxu1 }
 0x184   : > { %2508 = vmatmul.msk.f32.gmra.mxu3 %vm748_vm4, %v3187_v13 }
 0x186   : > { %v3408_v42 = vpop.f32.mrf.mxu2 }
 0x18b   : > { %2529 = vmatmul.msk.f32.gmra.mxu2 %vm748_vm4, %v3034_v22  ;;  %v874_v22 = vpop.f32.mrf.mxu0  ;;  %v993_v8 = vpop.f32.mrf.mxu1 }
 0x18c   : > { %2509 = vmatmul.msk.f32.gmra.mxu3 %vm748_vm4, %v3204_v32  ;;  %v991_v29 = vadd.f32 %v990_v35, %v874_v22 }
 0x18e   : > { %v1095_v46 = vpop.f32.mrf.mxu2 }
 0x18f   : > { %v1191_v21 = vadd.f32 %v1095_v46, %v979_v0 }
 0x191   : > { %v1227_v10 = vadd.f32 %v3417_v56, %v1191_v21 }
 0x193   : > { %2530 = vmatmul.msk.f32.gmra.mxu2 %vm748_vm4, %v3047_v33  ;;  %v3422_v3 = vmax.f32 %v1227_v10, 0.0  ;;  %v877_v38 = vpop.f32.mrf.mxu0  ;;  %v996_v6 = vpop.f32.mrf.mxu1 }
 0x195   : > { %1499 = vrot.lane.b32.xlu1 %v3422_v3, %s2704_s24  ;;  %v1419_v33 = vrot.slane %v3422_v3, 1  ;;  %v1323_v11 = vrot.slane %v3422_v3, 7 }
 0x196   : > { %v1098_v61 = vpop.f32.mrf.mxu2 }
 0x197   : > { %v1192_v9 = vadd.f32 %v1098_v61, %v982_v14 }
 0x199   : > { %v1228_v19 = vadd.f32 %v3417_v56, %v1192_v9 }
 0x19b   : > { %2531 = vmatmul.msk.f32.gmra.mxu2 %vm748_vm4, %v3065_v44  ;;  %v1260_v31 = vmax.f32 %v1228_v19, 0.0  ;;  %v880_v7 = vpop.f32.mrf.mxu0  ;;  %v999_v35 = vpop.f32.mrf.mxu1 }
 0x19d   : > { %1501 = vrot.lane.b32.xlu0 %v1260_v31, %s2704_s24  ;;  %v1420_v25 = vrot.slane %v1260_v31, 1  ;;  %v1324_v15 = vrot.slane %v1260_v31, 7 }
 0x19e   : > { %v1101_v39 = vpop.f32.mrf.mxu2 }
 0x19f   : > { %v1193_v1 = vadd.f32 %v1101_v39, %v985_v59  ;;  %v1421_v52 = vsel %vm386_vm0, %v1419_v33, %v1420_v25  ;;  %v3436_v44 = vsel %vm289_vm1, %v1323_v11, %v1324_v15  ;;  %v1483_v60 = vsel %vm386_vm0, %v1420_v25, 0.0  ;;  %v2609_v59 = vld [vmem:[%s4184_s3 + $0x38] sm:$0xff] }
 0x1a0   : > { %1611 = vrot.lane.b32.xlu2 %v1421_v52, %s2705_s25  ;;  %2118 = vmatpush.msrb.mxu1 %v2609_v59  ;;  %v994_v33 = vadd.f32 %v993_v8, %v877_v38 }
 0x1a1   : > { %v1229_v51 = vadd.f32 %v3417_v56, %v1193_v1 }
 0x1a3   : > { %2532 = vmatmul.msk.f32.gmra.mxu2 %vm748_vm4, %v3089_v62  ;;  %v3442_v49 = vmax.f32 %v1229_v51, 0.0  ;;  %v2544_v62 = vld [vmem:[%s4184_s3 + $0x20] sm:$0xff]  ;;  %v883_v22 = vpop.f32.mrf.mxu0  ;;  %v1002_v52 = vpop.f32.mrf.mxu1  ;;  %v997_v51 = vadd.f32 %v996_v6, %v880_v7 }
 0x1a4   : > { %1888 = vmatpush.msrb.mxu3 %v2544_v62  ;;  %v1000_v7 = vadd.f32 %v999_v35, %v883_v22 }
 0x1a5   : > { %1503 = vrot.lane.b32.xlu1 %v3442_v49, %s2704_s24  ;;  %v1422_v46 = vrot.slane %v3442_v49, 1  ;;  %v1326_v21 = vrot.slane %v3442_v49, 7 }
 0x1a6   : > { %v1104_v18 = vpop.f32.mrf.mxu2 }
 0x1a7   : > { %v1194_v63 = vadd.f32 %v1104_v18, %v988_v34 }
 0x1a8   : > { %1613 = vrot.lane.b32.xlu2 %v1483_v60, %s2705_s25 }
 0x1a9   : > { %v1230_v2 = vadd.f32 %v3417_v56, %v1194_v63 }
 0x1ab   : > { %2533 = vmatmul.msk.f32.gmra.mxu2 %vm748_vm4, %v3103_v26  ;;  %v1262_v43 = vmax.f32 %v1230_v2, 0.0  ;;  %v886_v34 = vpop.f32.mrf.mxu0  ;;  %v1005_v17 = vpop.f32.mrf.mxu1 }
 0x1ad   : > { %1505 = vrot.lane.b32.xlu1 %v1262_v43, %s2704_s24  ;;  %v1423_v0 = vrot.slane %v1262_v43, 1  ;;  %v1327_v10 = vrot.slane %v1262_v43, 7 }
 0x1ae   : > { %v1107_v14 = vpop.f32.mrf.mxu2 }
 0x1af   : > { %v1195_v61 = vadd.f32 %v1107_v14, %v991_v29  ;;  %v1484_v9 = vsel %vm386_vm0, %v1423_v0, 0.0  ;;  %v1424_v26 = vsel %vm386_vm0, %v1422_v46, %v1423_v0  ;;  %v3465_v19 = vsel %vm289_vm1, %v1326_v21, %v1327_v10 }
 0x1b0   : > { %1617 = vrot.lane.b32.xlu2 %v1484_v9, %s2705_s25  ;;  %1615 = vrot.lane.b32.xlu0 %v1424_v26, %s2705_s25  ;;  %v1003_v9 = vadd.f32 %v1002_v52, %v886_v34 }
 0x1b1   : > { %v1231_v31 = vadd.f32 %v3417_v56, %v1195_v61 }
 0x1b3   : > { %2534 = vmatmul.msk.f32.gmra.mxu2 %vm748_vm4, %v3123_v37  ;;  %v3475_v15 = vmax.f32 %v1231_v31, 0.0  ;;  %v889_v29 = vpop.f32.mrf.mxu0  ;;  %v1008_v59 = vpop.f32.mrf.mxu1 }
 0x1b5   : > { %v1425_v8 = vrot.slane %v3475_v15, 1  ;;  %v1329_v38 = vrot.slane %v3475_v15, 7 }
 0x1b6   : > { %v1110_v25 = vpop.f32.mrf.mxu2 }
 0x1b7   : > { %v1196_v39 = vadd.f32 %v1110_v25, %v994_v33 }
 0x1b8   : > { %1507 = vrot.lane.b32.xlu0 %v3475_v15, %s2704_s24 }
 0x1b9   : > { %v1232_v1 = vadd.f32 %v3417_v56, %v1196_v39 }
 0x1bb   : > { %2535 = vmatmul.msk.f32.gmra.mxu2 %vm748_vm4, %v3136_v54  ;;  %v1264_v37 = vmax.f32 %v1232_v1, 0.0  ;;  %v892_v1 = vpop.f32.mrf.mxu0 }
 0x1bd   : > { %1509 = vrot.lane.b32.xlu2 %v1264_v37, %s2704_s24  ;;  %v1426_v18 = vrot.slane %v1264_v37, 1  ;;  %v1330_v63 = vrot.slane %v1264_v37, 7  ;;  %v2543_v37 = vld [vmem:[%s4184_s3 + $0x18] sm:$0xff] }
 0x1be   : > { %v1113_v60 = vpop.f32.mrf.mxu2  ;;  %1889 = vmatpush.msrb.mxu3 %v2543_v37 }
 0x1bf   : > { %v1197_v2 = vadd.f32 %v1113_v60, %v997_v51  ;;  %v1485_v62 = vsel %vm386_vm0, %v1426_v18, 0.0  ;;  %v1427_v43 = vsel %vm386_vm0, %v1425_v8, %v1426_v18  ;;  %v3490_v54 = vsel %vm289_vm1, %v1329_v38, %v1330_v63  ;;  %v1771_v63 = vld [vmem:[%s4184_s3] sm:$0xff]  ;;  %v1011_v60 = vpop.f32.mrf.mxu1 }
 0x1c0   : > { %1621 = vrot.lane.b32.xlu0 %v1485_v62, %s2705_s25  ;;  %1619 = vrot.lane.b32.xlu1 %v1427_v43, %s2705_s25  ;;  %v1006_v51 = vadd.f32 %v1005_v17, %v889_v29  ;;  %v1009_v43 = vadd.f32 %v1008_v59, %v892_v1  ;;  %v2608_v29 = vld [vmem:[%s4184_s3 + $0x30] sm:$0xff] }
 0x1c1   : > { %v1233_v6 = vadd.f32 %v3417_v56, %v1197_v2  ;;  %2002 = vmatpush.msrb.mxu0 %v1771_v63  ;;  %2119 = vmatpush.msrb.mxu1 %v2608_v29 }
 0x1c2   : > { %2003 = vmatmul.f32.vlgmr.msrb.gmra.mxu0 %v2706_v23 }
 0x1c3   : > { %2536 = vmatmul.msk.f32.gmra.mxu2 %vm748_vm4, %v3147_v24  ;;  %v3497_v46 = vmax.f32 %v1233_v6, 0.0  ;;  %v895_v2 = vpop.f32.mrf.mxu0 }
 0x1c5   : > { %v1428_v26 = vrot.slane %v3497_v46, 1  ;;  %v1332_v35 = vrot.slane %v3497_v46, 7 }
 0x1c6   : > { %v1116_v0 = vpop.f32.mrf.mxu2 }
 0x1c7   : > { %v1198_v10 = vadd.f32 %v1116_v0, %v1000_v7 }
 0x1c8   : > { %1511 = vrot.lane.b32.xlu1 %v3497_v46, %s2704_s24 }
 0x1c9   : > { %v1234_v14 = vadd.f32 %v3417_v56, %v1198_v10 }
 0x1ca   : > { %2006 = vmatmul.f32.gmra.mxu0 %v2706_v23 }
 0x1cb   : > { %2537 = vmatmul.msk.f32.gmra.mxu2 %vm748_vm4, %v3162_v27  ;;  %v1266_v61 = vmax.f32 %v1234_v14, 0.0 }
 0x1cd   : > { %1513 = vrot.lane.b32.xlu0 %v1266_v61, %s2704_s24  ;;  %v1429_v24 = vrot.slane %v1266_v61, 1  ;;  %v1333_v22 = vrot.slane %v1266_v61, 7 }
 0x1ce   : > { %v1119_v31 = vpop.f32.mrf.mxu2 }
 0x1cf   : > { %v1199_v33 = vadd.f32 %v1119_v31, %v1003_v9  ;;  %v1486_v25 = vsel %vm386_vm0, %v1429_v24, 0.0  ;;  %v1430_v39 = vsel %vm386_vm0, %v1428_v26, %v1429_v24  ;;  %v3512_v27 = vsel %vm289_vm1, %v1332_v35, %v1333_v22  ;;  %v1014_v26 = vpop.f32.mrf.mxu1  ;;  %v898_v22 = vpop.f32.mrf.mxu0 }
 0x1d0   : > { %1625 = vrot.lane.b32.xlu1 %v1486_v25, %s2705_s25  ;;  %1623 = vrot.lane.b32.xlu2 %v1430_v39, %s2705_s25  ;;  %v1012_v31 = vadd.f32 %v1011_v60, %v895_v2  ;;  %v1015_v37 = vadd.f32 %v1014_v26, %v898_v22 }
 0x1d1   : > { %v1235_v52 = vadd.f32 %v3417_v56, %v1199_v33 }
 0x1d3   : > { %2538 = vmatmul.msk.f32.gmra.mxu2 %vm748_vm4, %v3176_v50  ;;  %v3522_v34 = vmax.f32 %v1235_v52, 0.0  ;;  %v1026_v52 = vpop.f32.mrf.mxu3 }
 0x1d5   : > { %v1431_v17 = vrot.slane %v3522_v34, 1  ;;  %v1335_v0 = vrot.slane %v3522_v34, 7 }
 0x1d6   : > { %v1122_v18 = vpop.f32.mrf.mxu2 }
 0x1d7   : > { %v1200_v8 = vadd.f32 %v1122_v18, %v1006_v51  ;;  %v1017_v51 = vpop.f32.mrf.mxu1  ;;  %v901_v60 = vpop.f32.mrf.mxu0 }
 0x1d8   : > { %1515 = vrot.lane.b32.xlu2 %v3522_v34, %s2704_s24 }
 0x1d9   : > { %v1236_v50 = vadd.f32 %v3417_v56, %v1200_v8 }
 0x1db   : > { %v1268_v62 = vmax.f32 %v1236_v50, 0.0  ;;  %2539 = vmatmul.msk.f32.gmra.mxu2 %vm748_vm4, %v3187_v13 }
 0x1dd   : > { %v1336_v6 = vrot.slane %v1268_v62, 7  ;;  %1517 = vrot.lane.b32.xlu1 %v1268_v62, %s2704_s24  ;;  %v1432_v7 = vrot.slane %v1268_v62, 1 }
 0x1de   : > { %v1125_v10 = vpop.f32.mrf.mxu2 }
 0x1df   : > { %v1201_v14 = vadd.f32 %v1125_v10, %v1009_v43  ;;  %v1487_v61 = vsel %vm386_vm0, %v1432_v7, 0.0  ;;  %v1433_v13 = vsel %vm386_vm0, %v1431_v17, %v1432_v7  ;;  %v3544_v9 = vsel %vm289_vm1, %v1335_v0, %v1336_v6  ;;  %v3574_v17 = vpop.f32.mrf.mxu3 }
 0x1e0   : > { %1629 = vrot.lane.b32.xlu2 %v1487_v61, %s2705_s25  ;;  %1627 = vrot.lane.b32.xlu0 %v1433_v13, %s2705_s25  ;;  %v1018_v7 = vadd.f32 %v1017_v51, %v901_v60  ;;  %v1020_v61 = vpop.f32.mrf.mxu1  ;;  %v904_v13 = vpop.f32.mrf.mxu0 }
 0x1e1   : > { %v1237_v24 = vadd.f32 %v3417_v56, %v1201_v14  ;;  %v1021_v22 = vadd.f32 %v1020_v61, %v904_v13 }
 0x1e3   : > { %2540 = vmatmul.msk.f32.gmra.mxu2 %vm748_vm4, %v3204_v32  ;;  %v3552_v59 = vmax.f32 %v1237_v24, 0.0 }
 0x1e5   : > { %v1338_v32 = vrot.slane %v3552_v59, 7  ;;  %v1434_v63 = vrot.slane %v3552_v59, 1 }
 0x1e6   : > { %v1128_v33 = vpop.f32.mrf.mxu2 }
 0x1e7   : > { %v1202_v25 = vadd.f32 %v1128_v33, %v1012_v31 }
 0x1e8   : > { %1519 = vrot.lane.b32.xlu0 %v3552_v59, %s2704_s24  ;;  %v907_v60 = vpop.f32.mrf.mxu0 }
 0x1e9   : > { %v1238_v39 = vadd.f32 %v3417_v56, %v1202_v25 }
 0x1eb   : > { %v1270_v1 = vmax.f32 %v1238_v39, 0.0  ;;  %2541 = vmatmul.msk.f32.gmra.mxu2 %vm748_vm4, %v3222_v5 }
 0x1ed   : > { %v1339_v18 = vrot.slane %v1270_v1, 7  ;;  %1521 = vrot.lane.b32.xlu2 %v1270_v1, %s2704_s24  ;;  %v1435_v8 = vrot.slane %v1270_v1, 1 }
 0x1ee   : > { %v1131_v50 = vpop.f32.mrf.mxu2 }
 0x1ef   : > { %v1203_v2 = vadd.f32 %v1131_v50, %v1015_v37  ;;  %v1488_v62 = vsel %vm386_vm0, %v1435_v8, 0.0  ;;  %v1436_v43 = vsel %vm386_vm0, %v1434_v63, %v1435_v8  ;;  %v3567_v5 = vsel %vm289_vm1, %v1338_v32, %v1339_v18  ;;  %v1032_v8 = vpop.f32.mrf.mxu3  ;;  %v1023_v63 = vpop.f32.mrf.mxu1 }
 0x1f0   : > { %1633 = vrot.lane.b32.xlu0 %v1488_v62, %s2705_s25  ;;  %1631 = vrot.lane.b32.xlu1 %v1436_v43, %s2705_s25 }
 0x1f1   : > { %v1239_v6 = vadd.f32 %v3417_v56, %v1203_v2  ;;  %v1024_v2 = vadd.f32 %v1023_v63, %v907_v60 }
 0x1f3   : > { %2542 = vmatmul.msk.f32.gmra.mxu2 %vm748_vm4, %v3240_v45  ;;  %v3576_v29 = vmax.f32 %v1239_v6, 0.0 }
 0x1f5   : > { %v1437_v33 = vrot.slane %v3576_v29, 1  ;;  %v1341_v25 = vrot.slane %v3576_v29, 7 }
 0x1f6   : > { %v1134_v10 = vpop.f32.mrf.mxu2 }
 0x1f7   : > { %v1204_v14 = vadd.f32 %v1134_v10, %v1018_v7 }
 0x1f8   : > { %1523 = vrot.lane.b32.xlu1 %v3576_v29, %s2704_s24 }
 0x1f9   : > { %v1240_v24 = vadd.f32 %v3417_v56, %v1204_v14  ;;  %v1403_v14 = vsel %vm289_vm1, 0.0, %v1323_v11 }
 0x1fa   : > { %v1612_v62 = vpop.permute.xlu2 %1611 }
 0x1fb   : > { %v1272_v26 = vmax.f32 %v1240_v24, 0.0  ;;  %1184 = vmatmul.f32.gmra.mxu2 %v2706_v23 }
 0x1fd   : > { %v1342_v31 = vrot.slane %v1272_v26, 7  ;;  %1525 = vrot.lane.b32.xlu0 %v1272_v26, %s2704_s24  ;;  %v1438_v45 = vrot.slane %v1272_v26, 1  ;;  %v1035_v26 = vpop.f32.mrf.mxu3 }
 0x1fe   : > { %v1137_v39 = vpop.f32.mrf.mxu2 }
 0x1ff   : > { %v1205_v1 = vadd.f32 %v1137_v39, %v1021_v22  ;;  %v1489_v37 = vsel %vm386_vm0, %v1438_v45, 0.0  ;;  %v1439_v51 = vsel %vm386_vm0, %v1437_v33, %v1438_v45  ;;  %v3590_v18 = vsel %vm289_vm1, %v1341_v25, %v1342_v31 }
 0x200   : > { %1637 = vrot.lane.b32.xlu1 %v1489_v37, %s2705_s25  ;;  %1635 = vrot.lane.b32.xlu2 %v1439_v51, %s2705_s25  ;;  %v1027_v31 = vadd.f32 %v1026_v52, %v3258_v48 }
 0x201   : > { %v1241_v50 = vadd.f32 %v3417_v56, %v1205_v1 }
 0x202   : > { %v1614_v48 = vpop.permute.xlu2 %1613 }
 0x203   : > { %1187 = vmatmul.f32.gmra.mxu2 %v2706_v23  ;;  %v3596_v43 = vmax.f32 %v1241_v50, 0.0 }
 0x205   : > { %v1440_v45 = vrot.slane %v3596_v43, 1  ;;  %v1344_v33 = vrot.slane %v3596_v43, 7 }
 0x206   : > { %v1140_v6 = vpop.f32.mrf.mxu2 }
 0x207   : > { %v1206_v7 = vadd.f32 %v1140_v6, %v1024_v2  ;;  %v1500_v10 = vpop.permute.xlu1 %1499  ;;  %v1030_v6 = vadd.f32 %v3574_v17, %v3275_v41 }
 0x208   : > { %v1707_v61 = vsel %vm675_vm2, %v1403_v14, %v1500_v10  ;;  %1527 = vrot.lane.b32.xlu2 %v3596_v43, %s2704_s24 }
 0x209   : > { %v1242_v13 = vadd.f32 %v3417_v56, %v1206_v7  ;;  %v1739_v24 = vsel %vm708_vm3, %v1707_v61, %v1612_v62  ;;  %v1038_v62 = vpop.f32.mrf.mxu3 }
 0x20a   : > { %2546 = vmatmul.msk.f32.vlgmr.msrb.gmra.mxu3 %vm748_vm4, %v1739_v24  ;;  %2578 = vmatmul.msk.f32.gmra.mxu0 %vm748_vm4, %v1739_v24  ;;  %v1033_v24 = vadd.f32 %v1032_v8, %v3292_v57  ;;  %v1404_v57 = vsel %vm289_vm1, 0.0, %v1326_v21 }
 0x20b   : > { %v1274_v22 = vmax.f32 %v1242_v13, 0.0 }
 0x20d   : > { %v1345_v3 = vrot.slane %v1274_v22, 7  ;;  %1529 = vrot.lane.b32.xlu1 %v1274_v22, %s2704_s24  ;;  %v1441_v11 = vrot.slane %v1274_v22, 1 }
 0x20e   : > { %v1143_v39 = vpop.f32.mrf.mxu2 }
 0x20f   : > { %v1207_v1 = vadd.f32 %v1143_v39, %v1027_v31  ;;  %v1502_v37 = vpop.permute.xlu0 %1501  ;;  %v1490_v51 = vsel %vm386_vm0, %v1441_v11, 0.0  ;;  %v1442_v63 = vsel %vm386_vm0, %v1440_v45, %v1441_v11  ;;  %v3617_v60 = vsel %vm289_vm1, %v1344_v33, %v1345_v3 }
 0x210   : > { %v1708_v52 = vsel %vm675_vm2, %v3436_v44, %v1502_v37  ;;  %1641 = vrot.lane.b32.xlu2 %v1490_v51, %s2705_s25  ;;  %1639 = vrot.lane.b32.xlu0 %v1442_v63, %s2705_s25 }
 0x211   : > { %v1740_v50 = vsel %vm708_vm3, %v1708_v52, %v1614_v48  ;;  %v1243_v2 = vadd.f32 %v3417_v56, %v1207_v1  ;;  %v1041_v3 = vpop.f32.mrf.mxu3  ;;  %v1036_v52 = vadd.f32 %v1035_v26, %v3304_v58  ;;  %v1039_v26 = vadd.f32 %v1038_v62, %v3315_v55 }
 0x212   : > { %2547 = vmatmul.msk.f32.gmra.mxu3 %vm748_vm4, %v1740_v50  ;;  %2579 = vmatmul.msk.f32.gmra.mxu0 %vm748_vm4, %v1740_v50 }
 0x213   : > { %v3629_v7 = vmax.f32 %v1243_v2, 0.0 }
 0x215   : > { %v1347_v22 = vrot.slane %v3629_v7, 7  ;;  %v1443_v41 = vrot.slane %v3629_v7, 1 }
 0x216   : > { %v1146_v10 = vpop.f32.mrf.mxu2 }
 0x217   : > { %v1208_v44 = vadd.f32 %v1146_v10, %v1030_v6  ;;  %v1504_v13 = vpop.permute.xlu1 %1503 }
 0x218   : > { %1531 = vrot.lane.b32.xlu0 %v3629_v7, %s2704_s24  ;;  %v1709_v8 = vsel %vm675_vm2, %v1404_v57, %v1504_v13 }
 0x219   : > { %v1244_v14 = vadd.f32 %v3417_v56, %v1208_v44  ;;  %v1044_v6 = vpop.f32.mrf.mxu3 }
 0x21b   : > { %v1276_v61 = vmax.f32 %v1244_v14, 0.0  ;;  %v1618_v14 = vpop.permute.xlu2 %1617 }
 0x21d   : > { %v1348_v31 = vrot.slane %v1276_v61, 7  ;;  %1533 = vrot.lane.b32.xlu2 %v1276_v61, %s2704_s24  ;;  %v1444_v17 = vrot.slane %v1276_v61, 1 }
 0x21e   : > { %v1149_v11 = vpop.f32.mrf.mxu2 }
 0x21f   : > { %v1209_v45 = vadd.f32 %v1149_v11, %v1033_v24  ;;  %v1445_v39 = vsel %vm386_vm0, %v1443_v41, %v1444_v17  ;;  %v1491_v1 = vsel %vm386_vm0, %v1444_v17, 0.0  ;;  %v3643_v37 = vsel %vm289_vm1, %v1347_v22, %v1348_v31  ;;  %v1506_v50 = vpop.permute.xlu1 %1505 }
 0x220   : > { %1643 = vrot.lane.b32.xlu1 %v1445_v39, %s2705_s25  ;;  %1645 = vrot.lane.b32.xlu0 %v1491_v1, %s2705_s25  ;;  %v1710_v10 = vsel %vm675_vm2, %v3465_v19, %v1506_v50  ;;  %v1405_v39 = vsel %vm289_vm1, 0.0, %v1329_v38 }
 0x221   : > { %v1245_v51 = vadd.f32 %v3417_v56, %v1209_v45  ;;  %v1742_v58 = vsel %vm708_vm3, %v1710_v10, %v1618_v14  ;;  %v1047_v1 = vpop.f32.mrf.mxu3 }
 0x222   : > { %v1616_v63 = vpop.permute.xlu0 %1615 }
 0x223   : > { %v1741_v48 = vsel %vm708_vm3, %v1709_v8, %v1616_v63  ;;  %v3657_v2 = vmax.f32 %v1245_v51, 0.0  ;;  %v1510_v38 = vpop.permute.xlu2 %1509 }
 0x224   : > { %2548 = vmatmul.msk.f32.gmra.mxu3 %vm748_vm4, %v1741_v48  ;;  %2580 = vmatmul.msk.f32.gmra.mxu0 %vm748_vm4, %v1741_v48  ;;  %v1712_v10 = vsel %vm675_vm2, %v3490_v54, %v1510_v38 }
 0x225   : > { %2611 = vmatmul.msk.f32.vlgmr.msrb.gmra.mxu1 %vm748_vm4, %v1741_v48  ;;  %v1446_v24 = vrot.slane %v3657_v2, 1  ;;  %v1350_v31 = vrot.slane %v3657_v2, 7  ;;  %v1042_v48 = vadd.f32 %v1041_v3, %v3326_v47  ;;  %v1045_v47 = vadd.f32 %v1044_v6, %v3337_v36 }
 0x226   : > { %v1152_v49 = vpop.f32.mrf.mxu2  ;;  %v1406_v36 = vsel %vm289_vm1, 0.0, %v1332_v35 }
 0x227   : > { %v1210_v21 = vadd.f32 %v1152_v49, %v1036_v52 }
 0x228   : > { %1535 = vrot.lane.b32.xlu1 %v3657_v2, %s2704_s24 }
 0x229   : > { %v1246_v44 = vadd.f32 %v3417_v56, %v1210_v21  ;;  %v1050_v3 = vpop.f32.mrf.mxu3 }
 0x22a   : > { %v1508_v41 = vpop.permute.xlu0 %1507 }
 0x22b   : > { %v1278_v61 = vmax.f32 %v1246_v44, 0.0  ;;  %v1711_v57 = vsel %vm675_vm2, %v1405_v39, %v1508_v41  ;;  %v1624_v46 = vpop.permute.xlu2 %1623 }
 0x22c   : > { %2549 = vmatmul.msk.f32.gmra.mxu3 %vm748_vm4, %v1742_v58  ;;  %2581 = vmatmul.msk.f32.gmra.mxu0 %vm748_vm4, %v1742_v58 }
 0x22d   : > { %v1351_v13 = vrot.slane %v1278_v61, 7  ;;  %2612 = vmatmul.msk.f32.gmra.mxu1 %vm748_vm4, %v1742_v58  ;;  %1537 = vrot.lane.b32.xlu0 %v1278_v61, %s2704_s24  ;;  %v1447_v19 = vrot.slane %v1278_v61, 1 }
 0x22e   : > { %v1155_v17 = vpop.f32.mrf.mxu2 }
 0x22f   : > { %v1211_v11 = vadd.f32 %v1155_v17, %v1039_v26  ;;  %v1492_v45 = vsel %vm386_vm0, %v1447_v19, 0.0  ;;  %v1448_v55 = vsel %vm386_vm0, %v1446_v24, %v1447_v19  ;;  %v3677_v62 = vsel %vm289_vm1, %v1350_v31, %v1351_v13 }
 0x230   : > { %1649 = vrot.lane.b32.xlu1 %v1492_v45, %s2705_s25  ;;  %1647 = vrot.lane.b32.xlu2 %v1448_v55, %s2705_s25  ;;  %v1048_v55 = vadd.f32 %v1047_v1, %v3348_v30  ;;  %v1051_v1 = vadd.f32 %v1050_v3, %v3356_v20 }
 0x231   : > { %v1247_v8 = vadd.f32 %v3417_v56, %v1211_v11  ;;  %v1053_v39 = vpop.f32.mrf.mxu3 }
 0x232   : > { %v1620_v51 = vpop.permute.xlu1 %1619  ;;  %v1622_v49 = vpop.permute.xlu0 %1621 }
 0x233   : > { %v1743_v63 = vsel %vm708_vm3, %v1711_v57, %v1620_v51  ;;  %v3691_v52 = vmax.f32 %v1247_v8, 0.0  ;;  %v1744_v14 = vsel %vm708_vm3, %v1712_v10, %v1622_v49 }
 0x234   : > { %2550 = vmatmul.msk.f32.gmra.mxu3 %vm748_vm4, %v1743_v63  ;;  %2582 = vmatmul.msk.f32.gmra.mxu0 %vm748_vm4, %v1743_v63 }
 0x235   : > { %2613 = vmatmul.msk.f32.gmra.mxu1 %vm748_vm4, %v1743_v63  ;;  %v1449_v13 = vrot.slane %v3691_v52, 1  ;;  %v1353_v54 = vrot.slane %v3691_v52, 7 }
 0x236   : > { %v1158_v15 = vpop.f32.mrf.mxu2 }
 0x237   : > { %v1212_v50 = vadd.f32 %v1158_v15, %v1042_v48 }
 0x238   : > { %1539 = vrot.lane.b32.xlu2 %v3691_v52, %s2704_s24 }
 0x239   : > { %v1248_v21 = vadd.f32 %v3417_v56, %v1212_v50 }
 0x23a   : > { %v1512_v58 = vpop.permute.xlu1 %1511 }
 0x23b   : > { %v1280_v44 = vmax.f32 %v1248_v21, 0.0  ;;  %v1713_v11 = vsel %vm675_vm2, %v1406_v36, %v1512_v58  ;;  %v1056_v58 = vpop.f32.mrf.mxu3 }
 0x23c   : > { %2551 = vmatmul.msk.f32.gmra.mxu3 %vm748_vm4, %v1744_v14  ;;  %2583 = vmatmul.msk.f32.gmra.mxu0 %vm748_vm4, %v1744_v14  ;;  %v1745_v45 = vsel %vm708_vm3, %v1713_v11, %v1624_v46 }
 0x23d   : > { %v1354_v61 = vrot.slane %v1280_v44, 7  ;;  %2614 = vmatmul.msk.f32.gmra.mxu1 %vm748_vm4, %v1744_v14  ;;  %1541 = vrot.lane.b32.xlu1 %v1280_v44, %s2704_s24  ;;  %v1450_v26 = vrot.slane %v1280_v44, 1  ;;  %v1516_v14 = vpop.permute.xlu2 %1515 }
 0x23e   : > { %v1161_v6 = vpop.f32.mrf.mxu2 }
 0x23f   : > { %v1213_v19 = vadd.f32 %v1161_v6, %v1045_v47  ;;  %v1493_v24 = vsel %vm386_vm0, %v1450_v26, 0.0  ;;  %v1451_v41 = vsel %vm386_vm0, %v1449_v13, %v1450_v26  ;;  %v3714_v17 = vsel %vm289_vm1, %v1353_v54, %v1354_v61  ;;  %v1514_v51 = vpop.permute.xlu0 %1513 }
 0x240   : > { %1653 = vrot.lane.b32.xlu2 %v1493_v24, %s2705_s25  ;;  %1651 = vrot.lane.b32.xlu0 %v1451_v41, %s2705_s25  ;;  %v1714_v38 = vsel %vm675_vm2, %v3512_v27, %v1514_v51  ;;  %v1407_v26 = vsel %vm289_vm1, 0.0, %v1335_v0  ;;  %v1054_v24 = vadd.f32 %v1053_v39, %v3363_v16  ;;  %v1057_v39 = vadd.f32 %v1056_v58, %v3370_v53 }
 0x241   : > { %v1249_v35 = vadd.f32 %v3417_v56, %v1213_v19  ;;  %v1715_v13 = vsel %vm675_vm2, %v1407_v26, %v1516_v14 }
 0x242   : > { %v1626_v48 = vpop.permute.xlu1 %1625 }
 0x243   : > { %v3725_v57 = vmax.f32 %v1249_v35, 0.0  ;;  %v1746_v30 = vsel %vm708_vm3, %v1714_v38, %v1626_v48 }
 0x244   : > { %2552 = vmatmul.msk.f32.gmra.mxu3 %vm748_vm4, %v1745_v45  ;;  %2584 = vmatmul.msk.f32.gmra.mxu0 %vm748_vm4, %v1745_v45 }
 0x245   : > { %2615 = vmatmul.msk.f32.gmra.mxu1 %vm748_vm4, %v1745_v45  ;;  %v1356_v49 = vrot.slane %v3725_v57, 7  ;;  %v1452_v10 = vrot.slane %v3725_v57, 1  ;;  %v1059_v45 = vpop.f32.mrf.mxu3 }
 0x246   : > { %v1164_v8 = vpop.f32.mrf.mxu2 }
 0x247   : > { %v1214_v63 = vadd.f32 %v1164_v8, %v1048_v55  ;;  %v1630_v55 = vpop.permute.xlu2 %1629 }
 0x248   : > { %1543 = vrot.lane.b32.xlu0 %v3725_v57, %s2704_s24 }
 0x249   : > { %v1250_v15 = vadd.f32 %v3417_v56, %v1214_v63 }
 0x24b   : > { %v1282_v50 = vmax.f32 %v1250_v15, 0.0 }
 0x24c   : > { %2553 = vmatmul.msk.f32.gmra.mxu3 %vm748_vm4, %v1746_v30  ;;  %2585 = vmatmul.msk.f32.gmra.mxu0 %vm748_vm4, %v1746_v30 }
 0x24d   : > { %v1357_v21 = vrot.slane %v1282_v50, 7  ;;  %2616 = vmatmul.msk.f32.gmra.mxu1 %vm748_vm4, %v1746_v30  ;;  %1545 = vrot.lane.b32.xlu2 %v1282_v50, %s2704_s24  ;;  %v1453_v44 = vrot.slane %v1282_v50, 1 }
 0x24e   : > { %v1167_v27 = vpop.f32.mrf.mxu2 }
 0x24f   : > { %v1215_v47 = vadd.f32 %v1167_v27, %v1051_v1  ;;  %v1454_v61 = vsel %vm386_vm0, %v1452_v10, %v1453_v44  ;;  %v1494_v20 = vsel %vm386_vm0, %v1453_v44, 0.0  ;;  %v3745_v3 = vsel %vm289_vm1, %v1356_v49, %v1357_v21  ;;  %v1518_v41 = vpop.permute.xlu1 %1517 }
 0x250   : > { %1655 = vrot.lane.b32.xlu1 %v1454_v61, %s2705_s25  ;;  %1657 = vrot.lane.b32.xlu0 %v1494_v20, %s2705_s25  ;;  %v1716_v46 = vsel %vm675_vm2, %v3544_v9, %v1518_v41  ;;  %v1408_v21 = vsel %vm289_vm1, 0.0, %v1338_v32  ;;  %v1060_v61 = vadd.f32 %v1059_v45, %v3375_v12  ;;  %v1522_v32 = vpop.permute.xlu2 %1521 }
 0x251   : > { %v1251_v36 = vadd.f32 %v3417_v56, %v1215_v47  ;;  %v1748_v16 = vsel %vm708_vm3, %v1716_v46, %v1630_v55  ;;  %v1062_v47 = vpop.f32.mrf.mxu3 }
 0x252   : > { %v1628_v6 = vpop.permute.xlu0 %1627  ;;  %v1063_v12 = vadd.f32 %v1062_v47, %v3381_v4  ;;  %v1409_v4 = vsel %vm289_vm1, 0.0, %v1341_v25 }
 0x253   : > { %v1747_v19 = vsel %vm708_vm3, %v1715_v13, %v1628_v6  ;;  %v3759_v11 = vmax.f32 %v1251_v36, 0.0  ;;  %v1718_v36 = vsel %vm675_vm2, %v3567_v5, %v1522_v32 }
 0x254   : > { %2554 = vmatmul.msk.f32.gmra.mxu3 %vm748_vm4, %v1747_v19  ;;  %2586 = vmatmul.msk.f32.gmra.mxu0 %vm748_vm4, %v1747_v19 }
 0x255   : > { %2617 = vmatmul.msk.f32.gmra.mxu1 %vm748_vm4, %v1747_v19  ;;  %v1455_v63 = vrot.slane %v3759_v11, 1  ;;  %v1359_v48 = vrot.slane %v3759_v11, 7 }
 0x256   : > { %v1170_v34 = vpop.f32.mrf.mxu2 }
 0x257   : > { %v1216_v0 = vadd.f32 %v1170_v34, %v1054_v24 }
 0x258   : > { %1547 = vrot.lane.b32.xlu1 %v3759_v11, %s2704_s24 }
 0x259   : > { %v1252_v35 = vadd.f32 %v3417_v56, %v1216_v0  ;;  %v1065_v46 = vpop.f32.mrf.mxu3 }
 0x25a   : > { %v1520_v15 = vpop.permute.xlu0 %1519  ;;  %v1636_v29 = vpop.permute.xlu2 %1635 }
 0x25b   : > { %v1284_v8 = vmax.f32 %v1252_v35, 0.0  ;;  %v1717_v10 = vsel %vm675_vm2, %v1408_v21, %v1520_v15 }
 0x25c   : > { %2555 = vmatmul.msk.f32.gmra.mxu3 %vm748_vm4, %v1748_v16  ;;  %2587 = vmatmul.msk.f32.gmra.mxu0 %vm748_vm4, %v1748_v16 }
 0x25d   : > { %v1360_v51 = vrot.slane %v1284_v8, 7  ;;  %2618 = vmatmul.msk.f32.gmra.mxu1 %vm748_vm4, %v1748_v16  ;;  %1549 = vrot.lane.b32.xlu0 %v1284_v8, %s2704_s24  ;;  %v1456_v9 = vrot.slane %v1284_v8, 1 }
 0x25e   : > { %v1173_v38 = vpop.f32.mrf.mxu2 }
 0x25f   : > { %v1217_v50 = vadd.f32 %v1173_v38, %v1057_v39  ;;  %v1495_v30 = vsel %vm386_vm0, %v1456_v9, 0.0  ;;  %v1457_v53 = vsel %vm386_vm0, %v1455_v63, %v1456_v9  ;;  %v3779_v1 = vsel %vm289_vm1, %v1359_v48, %v1360_v51 }
 0x260   : > { %1661 = vrot.lane.b32.xlu1 %v1495_v30, %s2705_s25  ;;  %1659 = vrot.lane.b32.xlu2 %v1457_v53, %s2705_s25  ;;  %v1066_v9 = vadd.f32 %v1065_v46, %v3387_v40 }
 0x261   : > { %v1253_v44 = vadd.f32 %v3417_v56, %v1217_v50  ;;  %v1068_v30 = vpop.f32.mrf.mxu3 }
 0x262   : > { %v1632_v27 = vpop.permute.xlu1 %1631  ;;  %v1634_v26 = vpop.permute.xlu0 %1633 }
 0x263   : > { %v1749_v14 = vsel %vm708_vm3, %v1717_v10, %v1632_v27  ;;  %v3793_v20 = vmax.f32 %v1253_v44, 0.0  ;;  %v1750_v6 = vsel %vm708_vm3, %v1718_v36, %v1634_v26  ;;  %v3835_v27 = vpop.f32.mrf.mxu0 }
 0x264   : > { %2556 = vmatmul.msk.f32.gmra.mxu3 %vm748_vm4, %v1749_v14  ;;  %2588 = vmatmul.msk.f32.gmra.mxu0 %vm748_vm4, %v1749_v14 }
 0x265   : > { %2619 = vmatmul.msk.f32.gmra.mxu1 %vm748_vm4, %v1749_v14  ;;  %v1458_v0 = vrot.slane %v3793_v20, 1  ;;  %v1362_v5 = vrot.slane %v3793_v20, 7  ;;  %v1069_v14 = vadd.f32 %v1068_v30, %v3396_v28  ;;  %v1411_v30 = vsel %vm289_vm1, 0.0, %v1347_v22 }
 0x266   : > { %v1176_v59 = vpop.f32.mrf.mxu2 }
 0x267   : > { %v1218_v58 = vadd.f32 %v1176_v59, %v1060_v61 }
 0x268   : > { %1551 = vrot.lane.b32.xlu2 %v3793_v20, %s2704_s24 }
 0x269   : > { %v1254_v13 = vadd.f32 %v3417_v56, %v1218_v58  ;;  %v1528_v58 = vpop.permute.xlu2 %1527 }
 0x26a   : > { %v1524_v41 = vpop.permute.xlu1 %1523 }
 0x26b   : > { %v1286_v19 = vmax.f32 %v1254_v13, 0.0  ;;  %v1719_v39 = vsel %vm675_vm2, %v1409_v4, %v1524_v41  ;;  %v3862_v46 = vpop.f32.mrf.mxu0 }
 0x26c   : > { %2557 = vmatmul.msk.f32.gmra.mxu3 %vm748_vm4, %v1750_v6  ;;  %2589 = vmatmul.msk.f32.gmra.mxu0 %vm748_vm4, %v1750_v6  ;;  %v1751_v51 = vsel %vm708_vm3, %v1719_v39, %v1636_v29 }
 0x26d   : > { %v1363_v24 = vrot.slane %v1286_v19, 7  ;;  %2620 = vmatmul.msk.f32.gmra.mxu1 %vm748_vm4, %v1750_v6  ;;  %1553 = vrot.lane.b32.xlu1 %v1286_v19, %s2704_s24  ;;  %v1459_v34 = vrot.slane %v1286_v19, 1  ;;  %v1410_v6 = vsel %vm289_vm1, 0.0, %v1344_v33  ;;  %v1071_v19 = vpop.f32.mrf.mxu3 }
 0x26e   : > { %v1179_v35 = vpop.f32.mrf.mxu2 }
 0x26f   : > { %v1219_v45 = vadd.f32 %v1179_v35, %v1063_v12  ;;  %v1496_v55 = vsel %vm386_vm0, %v1459_v34, 0.0  ;;  %v1460_v8 = vsel %vm386_vm0, %v1458_v0, %v1459_v34  ;;  %v3816_v16 = vsel %vm289_vm1, %v1362_v5, %v1363_v24  ;;  %v1526_v38 = vpop.permute.xlu0 %1525 }
 0x270   : > { %1665 = vrot.lane.b32.xlu2 %v1496_v55, %s2705_s25  ;;  %1663 = vrot.lane.b32.xlu0 %v1460_v8, %s2705_s25  ;;  %v1720_v10 = vsel %vm675_vm2, %v3590_v18, %v1526_v38  ;;  %v1721_v12 = vsel %vm675_vm2, %v1410_v6, %v1528_v58  ;;  %v1072_v0 = vadd.f32 %v1071_v19, %v3408_v42 }
 0x271   : > { %v1255_v25 = vadd.f32 %v3417_v56, %v1219_v45  ;;  %v1642_v8 = vpop.permute.xlu2 %1641 }
 0x272   : > { %v1638_v53 = vpop.permute.xlu1 %1637 }
 0x273   : > { %v3827_v63 = vmax.f32 %v1255_v25, 0.0  ;;  %v1752_v44 = vsel %vm708_vm3, %v1720_v10, %v1638_v53 }
 0x274   : > { %2558 = vmatmul.msk.f32.gmra.mxu3 %vm748_vm4, %v1751_v51  ;;  %2590 = vmatmul.msk.f32.gmra.mxu0 %vm748_vm4, %v1751_v51 }
 0x275   : > { %2621 = vmatmul.msk.f32.gmra.mxu1 %vm748_vm4, %v1751_v51  ;;  %v1365_v47 = vrot.slane %v3827_v63, 7  ;;  %v1461_v18 = vrot.slane %v3827_v63, 1 }
 0x276   : > { %v1182_v15 = vpop.f32.mrf.mxu2 }
 0x277   : > { %v1220_v50 = vadd.f32 %v1182_v15, %v1066_v9 }
 0x278   : > { %1555 = vrot.lane.b32.xlu0 %v3827_v63, %s2704_s24 }
 0x279   : > { %v1256_v21 = vadd.f32 %v3417_v56, %v1220_v50 }
 0x27b   : > { %v1288_v40 = vmax.f32 %v1256_v21, 0.0 }
 0x27c   : > { %2559 = vmatmul.msk.f32.gmra.mxu3 %vm748_vm4, %v1752_v44  ;;  %2591 = vmatmul.msk.f32.gmra.mxu0 %vm748_vm4, %v1752_v44 }
 0x27d   : > { %v1366_v61 = vrot.slane %v1288_v40, 7  ;;  %2622 = vmatmul.msk.f32.gmra.mxu1 %vm748_vm4, %v1752_v44  ;;  %1557 = vrot.lane.b32.xlu2 %v1288_v40, %s2704_s24  ;;  %v1462_v59 = vrot.slane %v1288_v40, 1  ;;  %v1534_v40 = vpop.permute.xlu2 %1533 }
 0x27e   : > { %v1185_v32 = vpop.f32.mrf.mxu2  ;;  %v1724_v7 = vsel %vm675_vm2, %v3643_v37, %v1534_v40 }
 0x27f   : > { %v1221_v26 = vadd.f32 %v1185_v32, %v1069_v14  ;;  %v1463_v13 = vsel %vm386_vm0, %v1461_v18, %v1462_v59  ;;  %v1497_v28 = vsel %vm386_vm0, %v1462_v59, 0.0  ;;  %v3849_v36 = vsel %vm289_vm1, %v1365_v47, %v1366_v61  ;;  %v1530_v4 = vpop.permute.xlu1 %1529 }
 0x280   : > { %1667 = vrot.lane.b32.xlu1 %v1463_v13, %s2705_s25  ;;  %1669 = vrot.lane.b32.xlu0 %v1497_v28, %s2705_s25  ;;  %v1722_v45 = vsel %vm675_vm2, %v3617_v60, %v1530_v4  ;;  %v1412_v32 = vsel %vm289_vm1, 0.0, %v1350_v31  ;;  %v3914_v13 = vld [vmem:[%s4185_s4] ss:$0 sm:$0xff] }
 0x281   : > { %v1257_v24 = vadd.f32 %v3417_v56, %v1221_v26  ;;  %v1754_v42 = vsel %vm708_vm3, %v1722_v45, %v1642_v8 }
 0x282   : > { %v1640_v41 = vpop.permute.xlu0 %1639 }
 0x283   : > { %v1753_v34 = vsel %vm708_vm3, %v1721_v12, %v1640_v41  ;;  %v3865_v43 = vmax.f32 %v1257_v24, 0.0 }
 0x284   : > { %2560 = vmatmul.msk.f32.gmra.mxu3 %vm748_vm4, %v1753_v34  ;;  %2592 = vmatmul.msk.f32.gmra.mxu0 %vm748_vm4, %v1753_v34 }
 0x285   : > { %2623 = vmatmul.msk.f32.gmra.mxu1 %vm748_vm4, %v1753_v34  ;;  %v1464_v60 = vrot.slane %v3865_v43, 1  ;;  %v1368_v51 = vrot.slane %v3865_v43, 7 }
 0x286   : > { %v1188_v33 = vpop.f32.mrf.mxu2 }
 0x287   : > { %v1222_v35 = vadd.f32 %v1188_v33, %v1072_v0 }
 0x288   : > { %1559 = vrot.lane.b32.xlu1 %v3865_v43, %s2704_s24 }
 0x289   : > { %v1258_v55 = vadd.f32 %v3417_v56, %v1222_v35  ;;  %v2010_v56 = vpop.f32.mrf.mxu0 }
 0x28a   : > { %v1532_v9 = vpop.permute.xlu0 %1531  ;;  %v1648_v28 = vpop.permute.xlu2 %1647 }
 0x28b   : > { %v1290_v39 = vmax.f32 %v1258_v55, 0.0  ;;  %v1723_v53 = vsel %vm675_vm2, %v1411_v30, %v1532_v9 }
 0x28c   : > { %2561 = vmatmul.msk.f32.gmra.mxu3 %vm748_vm4, %v1754_v42  ;;  %2593 = vmatmul.msk.f32.gmra.mxu0 %vm748_vm4, %v1754_v42 }
 0x28d   : > { %v1369_v29 = vrot.slane %v1290_v39, 7  ;;  %2624 = vmatmul.msk.f32.gmra.mxu1 %vm748_vm4, %v1754_v42  ;;  %1561 = vrot.lane.b32.xlu0 %v1290_v39, %s2704_s24  ;;  %v1465_v25 = vrot.slane %v1290_v39, 1  ;;  %v1891_v44 = vpop.f32.mrf.mxu3  ;;  %v2665_v42 = vld [vmem:[%s2753_s23 + $0x8] sm:$0xff] }
 0x28e   : > { %v2005_v37 = vadd.f32 %v3835_v27, %v1891_v44  ;;  %v2664_v27 = vld [vmem:[%s2753_s23] sm:$0xff] }
 0x28f   : > { %v1498_v15 = vsel %vm386_vm0, %v1465_v25, 0.0  ;;  %v1466_v38 = vsel %vm386_vm0, %v1464_v60, %v1465_v25  ;;  %v3884_v50 = vsel %vm289_vm1, %v1368_v51, %v1369_v29 }
 0x290   : > { %1673 = vrot.lane.b32.xlu1 %v1498_v15, %s2705_s25  ;;  %1671 = vrot.lane.b32.xlu2 %v1466_v38, %s2705_s25 }
 0x291   : > { %v3896_v61 = vpop.f32.mrf.mxu0 }
 0x292   : > { %v1644_v21 = vpop.permute.xlu1 %1643  ;;  %v1646_v14 = vpop.permute.xlu0 %1645 }
 0x293   : > { %v1755_v10 = vsel %vm708_vm3, %v1723_v53, %v1644_v21  ;;  %v1756_v22 = vsel %vm708_vm3, %v1724_v7, %v1646_v14 }
 0x294   : > { %2562 = vmatmul.msk.f32.gmra.mxu3 %vm748_vm4, %v1755_v10  ;;  %2594 = vmatmul.msk.f32.gmra.mxu0 %vm748_vm4, %v1755_v10 }
 0x295   : > { %2625 = vmatmul.msk.f32.gmra.mxu1 %vm748_vm4, %v1755_v10  ;;  %v1894_v59 = vpop.f32.mrf.mxu3 }
 0x296   : > { %v2008_v0 = vadd.f32 %v3862_v46, %v1894_v59  ;;  %v1540_v46 = vpop.permute.xlu2 %1539 }
 0x29a   : > { %v1536_v18 = vpop.permute.xlu1 %1535 }
 0x29b   : > { %v1725_v58 = vsel %vm675_vm2, %v1412_v32, %v1536_v18 }
 0x29c   : > { %2563 = vmatmul.msk.f32.gmra.mxu3 %vm748_vm4, %v1756_v22  ;;  %2595 = vmatmul.msk.f32.gmra.mxu0 %vm748_vm4, %v1756_v22  ;;  %v1757_v12 = vsel %vm708_vm3, %v1725_v58, %v1648_v28 }
 0x29d   : > { %2626 = vmatmul.msk.f32.gmra.mxu1 %vm748_vm4, %v1756_v22 }
 0x29e   : > { %v1654_v59 = vpop.permute.xlu2 %1653 }
 0x29f   : > { %v1538_v31 = vpop.permute.xlu0 %1537 }
 0x2a0   : > { %v1726_v35 = vsel %vm675_vm2, %v3677_v62, %v1538_v31  ;;  %v1413_v62 = vsel %vm289_vm1, 0.0, %v1353_v54  ;;  %v1414_v31 = vsel %vm289_vm1, 0.0, %v1356_v49 }
 0x2a1   : > { %v3909_v26 = vpop.f32.mrf.mxu0  ;;  %v1727_v38 = vsel %vm675_vm2, %v1413_v62, %v1540_v46 }
 0x2a2   : > { %v2121_v6 = vpop.f32.mrf.mxu1  ;;  %v1650_v34 = vpop.permute.xlu1 %1649 }
 0x2a3   : > { %v2217_v19 = vadd.f32 %v2121_v6, %v2005_v37  ;;  %v1758_v55 = vsel %vm708_vm3, %v1726_v35, %v1650_v34 }
 0x2a4   : > { %2564 = vmatmul.msk.f32.gmra.mxu3 %vm748_vm4, %v1757_v12  ;;  %2596 = vmatmul.msk.f32.gmra.mxu0 %vm748_vm4, %v1757_v12 }
 0x2a5   : > { %v2253_v2 = vadd.f32 %v3914_v13, %v2217_v19  ;;  %2627 = vmatmul.msk.f32.gmra.mxu1 %vm748_vm4, %v1757_v12 }
 0x2a7   : > { %v2285_v24 = vadd.f32 %v2664_v27, %v2253_v2  ;;  %v1897_v41 = vpop.f32.mrf.mxu3  ;;  %v1546_v49 = vpop.permute.xlu2 %1545 }
 0x2a8   : > { %v2011_v60 = vadd.f32 %v2010_v56, %v1897_v41  ;;  %v2666_v56 = vld [vmem:[%s2753_s23 + $0x10] sm:$0xff] }
 0x2a9   : > { %v2317_v4 = vmax.f32 %v2285_v24, 0.0  ;;  %v3930_v33 = vpop.f32.mrf.mxu0 }
 0x2aa   : > { %v2124_v45 = vpop.f32.mrf.mxu1 }
 0x2ab   : > { %2349 = vst.msk [vmem:[%s3927_s28] sm:$0xff] %vm675_vm2, %v2317_v4  ;;  %v2218_v8 = vadd.f32 %v2124_v45, %v2008_v0 }
 0x2ac   : > { %2565 = vmatmul.msk.f32.gmra.mxu3 %vm748_vm4, %v1758_v55  ;;  %2597 = vmatmul.msk.f32.gmra.mxu0 %vm748_vm4, %v1758_v55 }
 0x2ad   : > { %v2254_v39 = vadd.f32 %v3914_v13, %v2218_v8  ;;  %2628 = vmatmul.msk.f32.gmra.mxu1 %vm748_vm4, %v1758_v55 }
 0x2af   : > { %v2286_v29 = vadd.f32 %v2665_v42, %v2254_v39  ;;  %v1900_v25 = vpop.f32.mrf.mxu3  ;;  %v1542_v52 = vpop.permute.xlu1 %1541  ;;  %v1730_v42 = vsel %vm675_vm2, %v3745_v3, %v1546_v49  ;;  %v1415_v3 = vsel %vm289_vm1, 0.0, %v1359_v48 }
 0x2b0   : > { %v1728_v14 = vsel %vm675_vm2, %v3714_v17, %v1542_v52  ;;  %v2014_v7 = vadd.f32 %v3896_v61, %v1900_v25  ;;  %v2667_v61 = vld [vmem:[%s2753_s23 + $0x18] sm:$0xff] }
 0x2b1   : > { %v2318_v9 = vmax.f32 %v2286_v29, 0.0  ;;  %v3945_v15 = vpop.f32.mrf.mxu0  ;;  %v1760_v37 = vsel %vm708_vm3, %v1728_v14, %v1654_v59 }
 0x2b2   : > { %v2127_v30 = vpop.f32.mrf.mxu1  ;;  %v1652_v53 = vpop.permute.xlu0 %1651 }
 0x2b3   : > { %2350 = vst.msk [vmem:[%s3927_s28 + $0x8] sm:$0xff] %vm675_vm2, %v2318_v9  ;;  %v2219_v21 = vadd.f32 %v2127_v30, %v2011_v60  ;;  %v1759_v10 = vsel %vm708_vm3, %v1727_v38, %v1652_v53  ;;  %v2669_v9 = vld [vmem:[%s2753_s23 + $0x28] sm:$0xff] }
 0x2b4   : > { %2566 = vmatmul.msk.f32.gmra.mxu3 %vm748_vm4, %v1759_v10  ;;  %2598 = vmatmul.msk.f32.gmra.mxu0 %vm748_vm4, %v1759_v10 }
 0x2b5   : > { %v2255_v54 = vadd.f32 %v3914_v13, %v2219_v21  ;;  %2629 = vmatmul.msk.f32.gmra.mxu1 %vm748_vm4, %v1759_v10 }
 0x2b7   : > { %v2287_v44 = vadd.f32 %v2666_v56, %v2255_v54  ;;  %v1903_v40 = vpop.f32.mrf.mxu3 }
 0x2b8   : > { %v2017_v12 = vadd.f32 %v3909_v26, %v1903_v40  ;;  %v2668_v26 = vld [vmem:[%s2753_s23 + $0x20] sm:$0xff] }
 0x2b9   : > { %v2319_v22 = vmax.f32 %v2287_v44, 0.0  ;;  %v3959_v18 = vpop.f32.mrf.mxu0 }
 0x2ba   : > { %v2130_v32 = vpop.f32.mrf.mxu1  ;;  %v1544_v17 = vpop.permute.xlu0 %1543 }
 0x2bb   : > { %2351 = vst.msk [vmem:[%s3927_s28 + $0x10] sm:$0xff] %vm675_vm2, %v2319_v22  ;;  %v2220_v58 = vadd.f32 %v2130_v32, %v2014_v7  ;;  %v1729_v24 = vsel %vm675_vm2, %v1414_v31, %v1544_v17  ;;  %v1660_v54 = vpop.permute.xlu2 %1659 }
 0x2bc   : > { %2567 = vmatmul.msk.f32.gmra.mxu3 %vm748_vm4, %v1760_v37  ;;  %2599 = vmatmul.msk.f32.gmra.mxu0 %vm748_vm4, %v1760_v37 }
 0x2bd   : > { %v2256_v28 = vadd.f32 %v3914_v13, %v2220_v58  ;;  %2630 = vmatmul.msk.f32.gmra.mxu1 %vm748_vm4, %v1760_v37 }
 0x2bf   : > { %v2288_v6 = vadd.f32 %v2667_v61, %v2256_v28  ;;  %v1906_v19 = vpop.f32.mrf.mxu3 }
 0x2c0   : > { %v2020_v8 = vadd.f32 %v3930_v33, %v1906_v19  ;;  %v2671_v19 = vld [vmem:[%s2753_s23 + $0x38] sm:$0xff] }
 0x2c1   : > { %v2320_v2 = vmax.f32 %v2288_v6, 0.0  ;;  %v3973_v27 = vpop.f32.mrf.mxu0 }
 0x2c2   : > { %v2133_v41 = vpop.f32.mrf.mxu1  ;;  %v1656_v34 = vpop.permute.xlu1 %1655 }
 0x2c3   : > { %2352 = vst.msk [vmem:[%s3927_s28 + $0x18] sm:$0xff] %vm675_vm2, %v2320_v2  ;;  %v2221_v0 = vadd.f32 %v2133_v41, %v2017_v12  ;;  %v1761_v4 = vsel %vm708_vm3, %v1729_v24, %v1656_v34  ;;  %v1658_v55 = vpop.permute.xlu0 %1657 }
 0x2c4   : > { %2568 = vmatmul.msk.f32.gmra.mxu3 %vm748_vm4, %v1761_v4  ;;  %2600 = vmatmul.msk.f32.gmra.mxu0 %vm748_vm4, %v1761_v4  ;;  %v1762_v25 = vsel %vm708_vm3, %v1730_v42, %v1658_v55 }
 0x2c5   : > { %v2257_v57 = vadd.f32 %v3914_v13, %v2221_v0  ;;  %2631 = vmatmul.msk.f32.gmra.mxu1 %vm748_vm4, %v1761_v4 }
 0x2c7   : > { %v2289_v35 = vadd.f32 %v2668_v26, %v2257_v57  ;;  %v1909_v45 = vpop.f32.mrf.mxu3 }
 0x2c8   : > { %v2023_v21 = vadd.f32 %v3945_v15, %v1909_v45  ;;  %v2670_v15 = vld [vmem:[%s2753_s23 + $0x30] sm:$0xff] }
 0x2c9   : > { %v2321_v39 = vmax.f32 %v2289_v35, 0.0  ;;  %v3985_v46 = vpop.f32.mrf.mxu0 }
 0x2ca   : > { %v2136_v29 = vpop.f32.mrf.mxu1  ;;  %v1548_v33 = vpop.permute.xlu1 %1547 }
 0x2cb   : > { %2353 = vst.msk [vmem:[%s3927_s28 + $0x20] sm:$0xff] %vm675_vm2, %v2321_v39  ;;  %v2222_v62 = vadd.f32 %v2136_v29, %v2020_v8  ;;  %v1731_v53 = vsel %vm675_vm2, %v1415_v3, %v1548_v33 }
 0x2cc   : > { %2569 = vmatmul.msk.f32.gmra.mxu3 %vm748_vm4, %v1762_v25  ;;  %2601 = vmatmul.msk.f32.gmra.mxu0 %vm748_vm4, %v1762_v25  ;;  %v1763_v40 = vsel %vm708_vm3, %v1731_v53, %v1660_v54 }
 0x2cd   : > { %v2258_v60 = vadd.f32 %v3914_v13, %v2222_v62  ;;  %2632 = vmatmul.msk.f32.gmra.mxu1 %vm748_vm4, %v1762_v25 }
 0x2cf   : > { %v2290_v38 = vadd.f32 %v2669_v9, %v2258_v60  ;;  %v1912_v30 = vpop.f32.mrf.mxu3  ;;  %v1550_v48 = vpop.permute.xlu0 %1549 }
 0x2d0   : > { %v2026_v59 = vadd.f32 %v3959_v18, %v1912_v30  ;;  %v1732_v37 = vsel %vm675_vm2, %v3779_v1, %v1550_v48  ;;  %v1552_v18 = vpop.permute.xlu2 %1551  ;;  %v1416_v1 = vsel %vm289_vm1, 0.0, %v1362_v5  ;;  %v1417_v30 = vsel %vm289_vm1, 0.0, %v1365_v47 }
 0x2d1   : > { %v2322_v10 = vmax.f32 %v2290_v38, 0.0  ;;  %v4002_v52 = vpop.f32.mrf.mxu0  ;;  %v1733_v34 = vsel %vm675_vm2, %v1416_v1, %v1552_v18 }
 0x2d2   : > { %v2139_v56 = vpop.f32.mrf.mxu1  ;;  %v1662_v22 = vpop.permute.xlu1 %1661 }
 0x2d3   : > { %2354 = vst.msk [vmem:[%s3927_s28 + $0x28] sm:$0xff] %vm675_vm2, %v2322_v10  ;;  %v2223_v44 = vadd.f32 %v2139_v56, %v2023_v21  ;;  %v1764_v17 = vsel %vm708_vm3, %v1732_v37, %v1662_v22 }
 0x2d4   : > { %2570 = vmatmul.msk.f32.gmra.mxu3 %vm748_vm4, %v1763_v40  ;;  %2602 = vmatmul.msk.f32.gmra.mxu0 %vm748_vm4, %v1763_v40 }
 0x2d5   : > { %v2259_v11 = vadd.f32 %v3914_v13, %v2223_v44  ;;  %2633 = vmatmul.msk.f32.gmra.mxu1 %vm748_vm4, %v1763_v40 }
 0x2d7   : > { %v2291_v14 = vadd.f32 %v2670_v15, %v2259_v11  ;;  %v1915_v7 = vpop.f32.mrf.mxu3 }
 0x2d8   : > { %v2029_v31 = vadd.f32 %v3973_v27, %v1915_v7  ;;  %v2672_v27 = vld [vmem:[%s2753_s23 + $0x40] sm:$0xff]  ;;  %v1666_v42 = vpop.permute.xlu2 %1665 }
 0x2d9   : > { %v2323_v32 = vmax.f32 %v2291_v14, 0.0  ;;  %v4013_v58 = vpop.f32.mrf.mxu0 }
 0x2da   : > { %v2142_v28 = vpop.f32.mrf.mxu1 }
 0x2db   : > { %2355 = vst.msk [vmem:[%s3927_s28 + $0x30] sm:$0xff] %vm675_vm2, %v2323_v32  ;;  %v2224_v61 = vadd.f32 %v2142_v28, %v2026_v59 }
 0x2dc   : > { %2571 = vmatmul.msk.f32.gmra.mxu3 %vm748_vm4, %v1764_v17  ;;  %2603 = vmatmul.msk.f32.gmra.mxu0 %vm748_vm4, %v1764_v17 }
 0x2dd   : > { %v2260_v6 = vadd.f32 %v3914_v13, %v2224_v61  ;;  %2634 = vmatmul.msk.f32.gmra.mxu1 %vm748_vm4, %v1764_v17 }
 0x2df   : > { %v2292_v12 = vadd.f32 %v2671_v19, %v2260_v6  ;;  %v1918_v2 = vpop.f32.mrf.mxu3  ;;  %v1554_v20 = vpop.permute.xlu1 %1553 }
 0x2e0   : > { %v1734_v45 = vsel %vm675_vm2, %v3816_v16, %v1554_v20  ;;  %v2032_v55 = vadd.f32 %v3985_v46, %v1918_v2  ;;  %v2673_v46 = vld [vmem:[%s2753_s23 + $0x48] sm:$0xff]  ;;  %v1558_v47 = vpop.permute.xlu2 %1557 }
 0x2e1   : > { %v2324_v24 = vmax.f32 %v2292_v12, 0.0  ;;  %v4029_v41 = vpop.f32.mrf.mxu0  ;;  %v1766_v62 = vsel %vm708_vm3, %v1734_v45, %v1666_v42  ;;  %v1736_v22 = vsel %vm675_vm2, %v3849_v36, %v1558_v47  ;;  %v1418_v36 = vsel %vm289_vm1, 0.0, %v1368_v51 }
 0x2e2   : > { %v2145_v0 = vpop.f32.mrf.mxu1  ;;  %v1664_v4 = vpop.permute.xlu0 %1663 }
 0x2e3   : > { %2356 = vst.msk [vmem:[%s3927_s28 + $0x38] sm:$0xff] %vm675_vm2, %v2324_v24  ;;  %v2225_v57 = vadd.f32 %v2145_v0, %v2029_v31  ;;  %v1765_v49 = vsel %vm708_vm3, %v1733_v34, %v1664_v4  ;;  %v2676_v0 = vld [vmem:[%s2753_s23 + $0x60] sm:$0xff] }
 0x2e4   : > { %2572 = vmatmul.msk.f32.gmra.mxu3 %vm748_vm4, %v1765_v49  ;;  %2604 = vmatmul.msk.f32.gmra.mxu0 %vm748_vm4, %v1765_v49 }
 0x2e5   : > { %v2261_v5 = vadd.f32 %v3914_v13, %v2225_v57  ;;  %2635 = vmatmul.msk.f32.gmra.mxu1 %vm748_vm4, %v1765_v49 }
 0x2e7   : > { %v2293_v26 = vadd.f32 %v2672_v27, %v2261_v5  ;;  %v1921_v35 = vpop.f32.mrf.mxu3 }
 0x2e8   : > { %v2035_v38 = vadd.f32 %v4002_v52, %v1921_v35  ;;  %v2674_v52 = vld [vmem:[%s2753_s23 + $0x50] sm:$0xff] }
 0x2e9   : > { %v2325_v8 = vmax.f32 %v2293_v26, 0.0  ;;  %v4043_v39 = vpop.f32.mrf.mxu0 }
 0x2ea   : > { %v2148_v29 = vpop.f32.mrf.mxu1  ;;  %v1556_v16 = vpop.permute.xlu0 %1555 }
 0x2eb   : > { %2357 = vst.msk [vmem:[%s3927_s28 + $0x40] sm:$0xff] %vm675_vm2, %v2325_v8  ;;  %v2226_v25 = vadd.f32 %v2148_v29, %v2032_v55  ;;  %v1735_v21 = vsel %vm675_vm2, %v1417_v30, %v1556_v16  ;;  %v1672_v19 = vpop.permute.xlu2 %1671  ;;  %v2677_v8 = vld [vmem:[%s2753_s23 + $0x68] sm:$0xff] }
 0x2ec   : > { %2573 = vmatmul.msk.f32.gmra.mxu3 %vm748_vm4, %v1766_v62  ;;  %2605 = vmatmul.msk.f32.gmra.mxu0 %vm748_vm4, %v1766_v62 }
 0x2ed   : > { %v2262_v60 = vadd.f32 %v3914_v13, %v2226_v25  ;;  %2636 = vmatmul.msk.f32.gmra.mxu1 %vm748_vm4, %v1766_v62 }
 0x2ef   : > { %v2294_v33 = vadd.f32 %v2673_v46, %v2262_v60  ;;  %v1924_v9 = vpop.f32.mrf.mxu3  ;;  %v2678_v46 = vld [vmem:[%s2753_s23 + $0x70] sm:$0xff] }
 0x2f0   : > { %v2038_v15 = vadd.f32 %v4013_v58, %v1924_v9  ;;  %v2675_v58 = vld [vmem:[%s2753_s23 + $0x58] sm:$0xff] }
 0x2f1   : > { %v2326_v3 = vmax.f32 %v2294_v33, 0.0  ;;  %v4057_v53 = vpop.f32.mrf.mxu0 }
 0x2f2   : > { %v2151_v10 = vpop.f32.mrf.mxu1  ;;  %v1668_v54 = vpop.permute.xlu1 %1667 }
 0x2f3   : > { %2358 = vst.msk [vmem:[%s3927_s28 + $0x48] sm:$0xff] %vm675_vm2, %v2326_v3  ;;  %v2227_v56 = vadd.f32 %v2151_v10, %v2035_v38  ;;  %v1767_v44 = vsel %vm708_vm3, %v1735_v21, %v1668_v54  ;;  %v1670_v48 = vpop.permute.xlu0 %1669  ;;  %v2679_v10 = vld [vmem:[%s2753_s23 + $0x78] sm:$0xff] }
 0x2f4   : > { %2574 = vmatmul.msk.f32.gmra.mxu3 %vm748_vm4, %v1767_v44  ;;  %2606 = vmatmul.msk.f32.gmra.mxu0 %vm748_vm4, %v1767_v44  ;;  %v1768_v32 = vsel %vm708_vm3, %v1736_v22, %v1670_v48  ;;  %v2680_v48 = vld [vmem:[%s2753_s23 + $0x80] sm:$0xff] }
 0x2f5   : > { %v2263_v63 = vadd.f32 %v3914_v13, %v2227_v56  ;;  %2637 = vmatmul.msk.f32.gmra.mxu1 %vm748_vm4, %v1767_v44 }
 0x2f7   : > { %v2295_v40 = vadd.f32 %v2674_v52, %v2263_v63  ;;  %v1927_v11 = vpop.f32.mrf.mxu3 }
 0x2f8   : > { %v2041_v12 = vadd.f32 %v4029_v41, %v1927_v11 }
 0x2f9   : > { %v2327_v14 = vmax.f32 %v2295_v40, 0.0  ;;  %v2049_v7 = vpop.f32.mrf.mxu0 }
 0x2fa   : > { %v2154_v59 = vpop.f32.mrf.mxu1  ;;  %v1560_v17 = vpop.permute.xlu1 %1559 }
 0x2fb   : > { %2359 = vst.msk [vmem:[%s3927_s28 + $0x50] sm:$0xff] %vm675_vm2, %v2327_v14  ;;  %v2228_v37 = vadd.f32 %v2154_v59, %v2038_v15  ;;  %v1737_v18 = vsel %vm675_vm2, %v1418_v36, %v1560_v17 }
 0x2fc   : > { %2575 = vmatmul.msk.f32.gmra.mxu3 %vm748_vm4, %v1768_v32  ;;  %2607 = vmatmul.msk.f32.gmra.mxu0 %vm748_vm4, %v1768_v32  ;;  %v1769_v34 = vsel %vm708_vm3, %v1737_v18, %v1672_v19 }
 0x2fd   : > { %v2264_v28 = vadd.f32 %v3914_v13, %v2228_v37  ;;  %2638 = vmatmul.msk.f32.gmra.mxu1 %vm748_vm4, %v1768_v32 }
 0x2ff   : > { %v2296_v61 = vadd.f32 %v2675_v58, %v2264_v28  ;;  %v1930_v6 = vpop.f32.mrf.mxu3  ;;  %v1562_v51 = vpop.permute.xlu0 %1561  ;;  %v2681_v28 = vld [vmem:[%s2753_s23 + $0x88] sm:$0xff] }
 0x300   : > { %v2044_v49 = vadd.f32 %v4043_v39, %v1930_v6  ;;  %v1738_v5 = vsel %vm675_vm2, %v3884_v50, %v1562_v51 }
 0x301   : > { %v2328_v2 = vmax.f32 %v2296_v61, 0.0  ;;  %v2052_v1 = vpop.f32.mrf.mxu0 }
 0x302   : > { %v2157_v31 = vpop.f32.mrf.mxu1  ;;  %v1674_v57 = vpop.permute.xlu1 %1673 }
 0x303   : > { %2360 = vst.msk [vmem:[%s3927_s28 + $0x58] sm:$0xff] %vm675_vm2, %v2328_v2  ;;  %v2229_v24 = vadd.f32 %v2157_v31, %v2041_v12  ;;  %v1770_v26 = vsel %vm708_vm3, %v1738_v5, %v1674_v57  ;;  %v2682_v2 = vld [vmem:[%s2753_s23 + $0x90] sm:$0xff] }
 0x304   : > { %2576 = vmatmul.msk.f32.gmra.mxu3 %vm748_vm4, %v1769_v34 }
 0x305   : > { %v2265_v43 = vadd.f32 %v3914_v13, %v2229_v24  ;;  %2639 = vmatmul.msk.f32.gmra.mxu1 %vm748_vm4, %v1769_v34 }
 0x307   : > { %v2297_v4 = vadd.f32 %v2676_v0, %v2265_v43  ;;  %v1933_v41 = vpop.f32.mrf.mxu3 }
 0x308   : > { %v2047_v50 = vadd.f32 %v4057_v53, %v1933_v41  ;;  %v2683_v41 = vld [vmem:[%s2753_s23 + $0x98] sm:$0xff] }
 0x309   : > { %v2329_v20 = vmax.f32 %v2297_v4, 0.0  ;;  %v2055_v45 = vpop.f32.mrf.mxu0 }
 0x30a   : > { %v2160_v27 = vpop.f32.mrf.mxu1 }
 0x30b   : > { %2361 = vst.msk [vmem:[%s3927_s28 + $0x60] sm:$0xff] %vm675_vm2, %v2329_v20  ;;  %v2230_v35 = vadd.f32 %v2160_v27, %v2044_v49 }
 0x30c   : > { %2577 = vmatmul.msk.f32.gmra.mxu3 %vm748_vm4, %v1770_v26 }
 0x30d   : > { %v2266_v55 = vadd.f32 %v3914_v13, %v2230_v35  ;;  %2640 = vmatmul.msk.f32.gmra.mxu1 %vm748_vm4, %v1770_v26 }
 0x30f   : > { %v2298_v39 = vadd.f32 %v2677_v8, %v2266_v55  ;;  %v1936_v42 = vpop.f32.mrf.mxu3 }
 0x310   : > { %v2050_v38 = vadd.f32 %v2049_v7, %v1936_v42 }
 0x311   : > { %v2330_v29 = vmax.f32 %v2298_v39, 0.0  ;;  %v2058_v16 = vpop.f32.mrf.mxu0 }
 0x312   : > { %v2163_v25 = vpop.f32.mrf.mxu1 }
 0x313   : > { %2362 = vst.msk [vmem:[%s3927_s28 + $0x68] sm:$0xff] %vm675_vm2, %v2330_v29  ;;  %v2231_v62 = vadd.f32 %v2163_v25, %v2047_v50 }
 0x315   : > { %v2267_v60 = vadd.f32 %v3914_v13, %v2231_v62  ;;  %2210 = vmatmul.f32.gmra.mxu1 %v2706_v23 }
 0x317   : > { %v2299_v33 = vadd.f32 %v2678_v46, %v2267_v60  ;;  %v1939_v9 = vpop.f32.mrf.mxu3  ;;  %v2685_v60 = vld [vmem:[%s2753_s23 + $0xa8] sm:$0xff] }
 0x318   : > { %v2053_v63 = vadd.f32 %v2052_v1, %v1939_v9 }
 0x319   : > { %v2331_v3 = vmax.f32 %v2299_v33, 0.0  ;;  %v2061_v44 = vpop.f32.mrf.mxu0 }
 0x31a   : > { %v2166_v30 = vpop.f32.mrf.mxu1 }
 0x31b   : > { %2363 = vst.msk [vmem:[%s3927_s28 + $0x70] sm:$0xff] %vm675_vm2, %v2331_v3  ;;  %v2232_v53 = vadd.f32 %v2166_v30, %v2050_v38 }
 0x31d   : > { %v2268_v21 = vadd.f32 %v3914_v13, %v2232_v53  ;;  %2213 = vmatmul.f32.gmra.mxu1 %v2706_v23 }
 0x31f   : > { %v2300_v54 = vadd.f32 %v2679_v10, %v2268_v21  ;;  %v1942_v56 = vpop.f32.mrf.mxu3  ;;  %v2686_v21 = vld [vmem:[%s2753_s23 + $0xb0] sm:$0xff] }
 0x320   : > { %v2056_v7 = vadd.f32 %v2055_v45, %v1942_v56  ;;  %v2684_v45 = vld [vmem:[%s2753_s23 + $0xa0] sm:$0xff] }
 0x321   : > { %v2332_v47 = vmax.f32 %v2300_v54, 0.0  ;;  %v2064_v22 = vpop.f32.mrf.mxu0 }
 0x322   : > { %v2169_v52 = vpop.f32.mrf.mxu1 }
 0x323   : > { %2364 = vst.msk [vmem:[%s3927_s28 + $0x78] sm:$0xff] %vm675_vm2, %v2332_v47  ;;  %v2233_v40 = vadd.f32 %v2169_v52, %v2053_v63 }
 0x325   : > { %v2269_v11 = vadd.f32 %v3914_v13, %v2233_v40 }
 0x327   : > { %v2301_v15 = vadd.f32 %v2680_v48, %v2269_v11  ;;  %v1945_v14 = vpop.f32.mrf.mxu3  ;;  %v2687_v11 = vld [vmem:[%s2753_s23 + $0xb8] sm:$0xff] }
 0x328   : > { %v2059_v61 = vadd.f32 %v2058_v16, %v1945_v14 }
 0x329   : > { %v2333_v23 = vmax.f32 %v2301_v15, 0.0  ;;  %v2067_v19 = vpop.f32.mrf.mxu0 }
 0x32a   : > { %v2172_v59 = vpop.f32.mrf.mxu1 }
 0x32b   : > { %2365 = vst.msk [vmem:[%s3927_s28 + $0x80] sm:$0xff] %vm675_vm2, %v2333_v23  ;;  %v2234_v32 = vadd.f32 %v2172_v59, %v2056_v7 }
 0x32d   : > { %v2270_v37 = vadd.f32 %v3914_v13, %v2234_v32 }
 0x32f   : > { %v2302_v17 = vadd.f32 %v2681_v28, %v2270_v37  ;;  %v1948_v58 = vpop.f32.mrf.mxu3  ;;  %v2688_v37 = vld [vmem:[%s2753_s23 + $0xc0] sm:$0xff] }
 0x330   : > { %v2062_v24 = vadd.f32 %v2061_v44, %v1948_v58 }
 0x331   : > { %v2334_v36 = vmax.f32 %v2302_v17, 0.0  ;;  %v2070_v4 = vpop.f32.mrf.mxu0 }
 0x332   : > { %v2175_v6 = vpop.f32.mrf.mxu1 }
 0x333   : > { %2366 = vst.msk [vmem:[%s3927_s28 + $0x88] sm:$0xff] %vm675_vm2, %v2334_v36  ;;  %v2235_v18 = vadd.f32 %v2175_v6, %v2059_v61 }
 0x335   : > { %v2271_v12 = vadd.f32 %v3914_v13, %v2235_v18 }
 0x337   : > { %v2303_v1 = vadd.f32 %v2682_v2, %v2271_v12  ;;  %v1951_v31 = vpop.f32.mrf.mxu3 }
 0x338   : > { %v2065_v20 = vadd.f32 %v2064_v22, %v1951_v31 }
 0x339   : > { %v2335_v34 = vmax.f32 %v2303_v1, 0.0  ;;  %v2073_v39 = vpop.f32.mrf.mxu0 }
 0x33a   : > { %v2178_v43 = vpop.f32.mrf.mxu1 }
 0x33b   : > { %2367 = vst.msk [vmem:[%s3927_s28 + $0x90] sm:$0xff] %vm675_vm2, %v2335_v34  ;;  %v2236_v51 = vadd.f32 %v2178_v43, %v2062_v24 }
 0x33d   : > { %v2272_v0 = vadd.f32 %v3914_v13, %v2236_v51 }
 0x33f   : > { %v2304_v57 = vadd.f32 %v2683_v41, %v2272_v0  ;;  %v1954_v49 = vpop.f32.mrf.mxu3  ;;  %v2690_v0 = vld [vmem:[%s2753_s23 + $0xd0] sm:$0xff] }
 0x340   : > { %v2068_v42 = vadd.f32 %v2067_v19, %v1954_v49  ;;  %v2689_v19 = vld [vmem:[%s2753_s23 + $0xc8] sm:$0xff] }
 0x341   : > { %v2336_v5 = vmax.f32 %v2304_v57, 0.0  ;;  %v2076_v38 = vpop.f32.mrf.mxu0 }
 0x342   : > { %v2181_v27 = vpop.f32.mrf.mxu1 }
 0x343   : > { %2368 = vst.msk [vmem:[%s3927_s28 + $0x98] sm:$0xff] %vm675_vm2, %v2336_v5  ;;  %v2237_v26 = vadd.f32 %v2181_v27, %v2065_v20 }
 0x345   : > { %v2273_v35 = vadd.f32 %v3914_v13, %v2237_v26 }
 0x347   : > { %v2305_v55 = vadd.f32 %v2684_v45, %v2273_v35  ;;  %v1957_v8 = vpop.f32.mrf.mxu3  ;;  %v2691_v35 = vld [vmem:[%s2753_s23 + $0xd8] sm:$0xff] }
 0x348   : > { %v2071_v33 = vadd.f32 %v2070_v4, %v1957_v8 }
 0x349   : > { %v2337_v50 = vmax.f32 %v2305_v55, 0.0  ;;  %v2079_v52 = vpop.f32.mrf.mxu0 }
 0x34a   : > { %v2184_v29 = vpop.f32.mrf.mxu1 }
 0x34b   : > { %2369 = vst.msk [vmem:[%s3927_s28 + $0xa0] sm:$0xff] %vm675_vm2, %v2337_v50  ;;  %v2238_v25 = vadd.f32 %v2184_v29, %v2068_v42 }
 0x34d   : > { %v2274_v62 = vadd.f32 %v3914_v13, %v2238_v25 }
 0x34f   : > { %v2306_v16 = vadd.f32 %v2685_v60, %v2274_v62  ;;  %v1960_v46 = vpop.f32.mrf.mxu3  ;;  %v2692_v62 = vld [vmem:[%s2753_s23 + $0xe0] sm:$0xff] }
 0x350   : > { %v2074_v56 = vadd.f32 %v2073_v39, %v1960_v46 }
 0x351   : > { %v2338_v9 = vmax.f32 %v2306_v16, 0.0  ;;  %v2082_v32 = vpop.f32.mrf.mxu0 }
 0x352   : > { %v2187_v3 = vpop.f32.mrf.mxu1 }
 0x353   : > { %2370 = vst.msk [vmem:[%s3927_s28 + $0xa8] sm:$0xff] %vm675_vm2, %v2338_v9  ;;  %v2239_v30 = vadd.f32 %v2187_v3, %v2071_v33 }
 0x355   : > { %v2275_v53 = vadd.f32 %v3914_v13, %v2239_v30 }
 0x357   : > { %v2307_v10 = vadd.f32 %v2686_v21, %v2275_v53  ;;  %v1963_v54 = vpop.f32.mrf.mxu3  ;;  %v2693_v53 = vld [vmem:[%s2753_s23 + $0xe8] sm:$0xff] }
 0x358   : > { %v2077_v14 = vadd.f32 %v2076_v38, %v1963_v54 }
 0x359   : > { %v2339_v44 = vmax.f32 %v2307_v10, 0.0  ;;  %v2085_v1 = vpop.f32.mrf.mxu0 }
 0x35a   : > { %v2190_v63 = vpop.f32.mrf.mxu1 }
 0x35b   : > { %2371 = vst.msk [vmem:[%s3927_s28 + $0xb0] sm:$0xff] %vm675_vm2, %v2339_v44  ;;  %v2240_v47 = vadd.f32 %v2190_v63, %v2074_v56 }
 0x35d   : > { %v2276_v40 = vadd.f32 %v3914_v13, %v2240_v47 }
 0x35f   : > { %v2308_v48 = vadd.f32 %v2687_v11, %v2276_v40  ;;  %v1966_v15 = vpop.f32.mrf.mxu3 }
 0x360   : > { %v2080_v58 = vadd.f32 %v2079_v52, %v1966_v15  ;;  %v2694_v52 = vld [vmem:[%s2753_s23 + $0xf0] sm:$0xff] }
 0x361   : > { %v2340_v7 = vmax.f32 %v2308_v48, 0.0  ;;  %v2088_v20 = vpop.f32.mrf.mxu0 }
 0x362   : > { %v2193_v23 = vpop.f32.mrf.mxu1 }
 0x363   : > { %2372 = vst.msk [vmem:[%s3927_s28 + $0xb8] sm:$0xff] %vm675_vm2, %v2340_v7  ;;  %v2241_v22 = vadd.f32 %v2193_v23, %v2077_v14 }
 0x365   : > { %v2277_v59 = vadd.f32 %v3914_v13, %v2241_v22  ;;  %v2695_v22 = vld [vmem:[%s2753_s23 + $0xf8] sm:$0xff] }
 0x367   : > { %v2309_v28 = vadd.f32 %v2688_v37, %v2277_v59  ;;  %v1969_v17 = vpop.f32.mrf.mxu3 }
 0x368   : > { %v2083_v31 = vadd.f32 %v2082_v32, %v1969_v17 }
 0x369   : > { %v2341_v61 = vmax.f32 %v2309_v28, 0.0  ;;  %v2091_v29 = vpop.f32.mrf.mxu0 }
 0x36a   : > { %v2196_v36 = vpop.f32.mrf.mxu1 }
 0x36b   : > { %2373 = vst.msk [vmem:[%s3927_s28 + $0xc0] sm:$0xff] %vm675_vm2, %v2341_v61  ;;  %v2242_v6 = vadd.f32 %v2196_v36, %v2080_v58 }
 0x36d   : > { %v2278_v18 = vadd.f32 %v3914_v13, %v2242_v6 }
 0x36f   : > { %v2310_v12 = vadd.f32 %v2689_v19, %v2278_v18  ;;  %v1972_v2 = vpop.f32.mrf.mxu3 }
 0x370   : > { %v2086_v57 = vadd.f32 %v2085_v1, %v1972_v2 }
 0x371   : > { %v2342_v24 = vmax.f32 %v2310_v12, 0.0  ;;  %v2094_v30 = vpop.f32.mrf.mxu0 }
 0x372   : > { %v2199_v34 = vpop.f32.mrf.mxu1 }
 0x373   : > { %2374 = vst.msk [vmem:[%s3927_s28 + $0xc8] sm:$0xff] %vm675_vm2, %v2342_v24  ;;  %v2243_v43 = vadd.f32 %v2199_v34, %v2083_v31 }
 0x375   : > { %v2279_v51 = vadd.f32 %v3914_v13, %v2243_v43 }
 0x377   : > { %v2311_v4 = vadd.f32 %v2690_v0, %v2279_v51  ;;  %v1975_v41 = vpop.f32.mrf.mxu3 }
 0x378   : > { %v2089_v55 = vadd.f32 %v2088_v20, %v1975_v41 }
 0x379   : > { %v2343_v49 = vmax.f32 %v2311_v4, 0.0  ;;  %v2097_v11 = vpop.f32.mrf.mxu0 }
 0x37a   : > { %v2202_v5 = vpop.f32.mrf.mxu1 }
 0x37b   : > { %2375 = vst.msk [vmem:[%s3927_s28 + $0xd0] sm:$0xff] %vm675_vm2, %v2343_v49  ;;  %v2244_v27 = vadd.f32 %v2202_v5, %v2086_v57 }
 0x37d   : > { %v2280_v26 = vadd.f32 %v3914_v13, %v2244_v27 }
 0x37f   : > { %v2312_v45 = vadd.f32 %v2691_v35, %v2280_v26  ;;  %v1978_v39 = vpop.f32.mrf.mxu3 }
 0x380   : > { %v2092_v16 = vadd.f32 %v2091_v29, %v1978_v39 }
 0x381   : > { %v2344_v8 = vmax.f32 %v2312_v45, 0.0 }
 0x382   : > { %v2205_v42 = vpop.f32.mrf.mxu1 }
 0x383   : > { %2376 = vst.msk [vmem:[%s3927_s28 + $0xd8] sm:$0xff] %vm675_vm2, %v2344_v8  ;;  %v2245_v50 = vadd.f32 %v2205_v42, %v2089_v55 }
 0x385   : > { %v2281_v25 = vadd.f32 %v3914_v13, %v2245_v50 }
 0x387   : > { %v2313_v60 = vadd.f32 %v2692_v62, %v2281_v25  ;;  %v1981_v38 = vpop.f32.mrf.mxu3 }
 0x388   : > { %v2095_v10 = vadd.f32 %v2094_v30, %v1981_v38 }
 0x389   : > { %v2345_v46 = vmax.f32 %v2313_v60, 0.0 }
 0x38a   : > { %v2208_v33 = vpop.f32.mrf.mxu1 }
 0x38b   : > { %2377 = vst.msk [vmem:[%s3927_s28 + $0xe0] sm:$0xff] %vm675_vm2, %v2345_v46  ;;  %v2246_v9 = vadd.f32 %v2208_v33, %v2092_v16 }
 0x38d   : > { %v2282_v3 = vadd.f32 %v3914_v13, %v2246_v9 }
 0x38f   : > { %v2314_v21 = vadd.f32 %v2693_v53, %v2282_v3  ;;  %v1984_v47 = vpop.f32.mrf.mxu3 }
 0x390   : > { %v2098_v48 = vadd.f32 %v2097_v11, %v1984_v47 }
 0x391   : > { %v2346_v54 = vmax.f32 %v2314_v21, 0.0 }
 0x392   : > { %v2211_v56 = vpop.f32.mrf.mxu1 }
 0x393   : > { %2378 = vst.msk [vmem:[%s3927_s28 + $0xe8] sm:$0xff] %vm675_vm2, %v2346_v54  ;;  %v2247_v44 = vadd.f32 %v2211_v56, %v2095_v10 }
 0x395   : > { %v2283_v63 = vadd.f32 %v3914_v13, %v2247_v44 }
 0x397   : > { %v2315_v40 = vadd.f32 %v2694_v52, %v2283_v63 }
 0x399   : > { %v2347_v15 = vmax.f32 %v2315_v40, 0.0 }
 0x39a   : > { %v2214_v14 = vpop.f32.mrf.mxu1 }
 0x39b   : > { %2379 = vst.msk [vmem:[%s3927_s28 + $0xf0] sm:$0xff] %vm675_vm2, %v2347_v15  ;;  %v2248_v7 = vadd.f32 %v2214_v14, %v2098_v48 }
 0x39d   : > { %v2284_v23 = vadd.f32 %v3914_v13, %v2248_v7 }
 0x39f   : > { %v2316_v59 = vadd.f32 %v2695_v22, %v2284_v23 }
 0x3a1   : > { %v2348_v32 = vmax.f32 %v2316_v59, 0.0 }
 0x3a3   : > { %2380 = vst.msk [vmem:[%s3927_s28 + $0xf8] sm:$0xff] %vm675_vm2, %v2348_v32 }
 0x3a4 PF: > { %s15_s18 = sadd.s32 1, %s2702_s18  }
 0x3a5   : > { %p12_p4 = scmp.ge.s32.totalorder %s15_s18, 4  }
 0x3a7   :  { %14 = sbr.rel (!%p12_p4) target bundleno = 1 (0x1), region = 74 }

</bundles_post_ra>
